<compile_context>
chip_gen: v6e
topology: v6e:2x2x1
jax: 0.10.0
libtpu: 0.0.40
codegen_flags: <defaults>
</compile_context>

<pallas_src>
import functools

import jax
import jax.numpy as jnp
import numpy as np
from jax.experimental import pallas as pl
from jax.experimental.pallas import tpu as pltpu


def _lstm_head_kernel(T, B, D, L,
                      gx0_ref, whh0_ref, wcat_ref, bcat_ref, hw_ref, hb_ref,
                      out_ref):
    """gx0_ref:  (T, B, 4D)     layer-0 gate pre-activations (bias folded in)
       whh0_ref: (D, 4D)        W_hh^T of layer 0, columns in [f, i, o, g] order
       wcat_ref: (L-1, 2D, 4D)  fused [W_ih^T ; W_hh^T] for layers >= 1
       bcat_ref: (L-1, 1, 4D)   pre-summed biases for layers >= 1
       hw_ref:   (D, 128)       head weight in lane 0, zero elsewhere
       hb_ref:   (1, 128)       head bias in lane 0
       out_ref:  (B, 128)       lane-dense output; column 0 holds the logit"""
    f32 = jnp.float32

    # Hoisted per-lane constants: one tanh covers sigmoid(f,i,o) and tanh(g).
    lane = jax.lax.broadcasted_iota(jnp.int32, (1, 4 * D), 1)
    is_g = lane >= 3 * D
    g_scale = jnp.where(is_g, f32(1.0), f32(0.5))   # x -> 0.5x for sigmoid lanes
    g_shift = jnp.where(is_g, f32(0.0), f32(0.5))   # +0.5 for sigmoid lanes

    # Hoisted weight loads (reused every step).
    whh0 = whh0_ref[...]                             # (D, 4D)
    wcat = [wcat_ref[l] for l in range(L - 1)]       # each (2D, 4D)
    bcat = [bcat_ref[l] for l in range(L - 1)]       # each (1, 4D)

    h = [jnp.zeros((B, D), f32) for _ in range(L)]
    c = [jnp.zeros((B, D), f32) for _ in range(L)]

    # Wavefront over anti-diagonals: layer l handles step t = d - l. Layers are
    # traced in reverse order within a diagonal so layer l reads layer l-1's
    # output from the PREVIOUS diagonal (i.e. the same timestep) before layer
    # l-1 overwrites it. Fully unrolled: T and L are tiny and static.
    for d in range(T + L - 1):
        for l in reversed(range(L)):
            t = d - l
            if not (0 <= t < T):
                continue
            if l == 0:
                # Input projection precomputed on the host (3-row table gather).
                gates = gx0_ref[t] + jnp.dot(
                    h[0], whh0, preferred_element_type=f32)          # (B, 4D)
            else:
                # Fused [x_t ; h_{t-1}] @ W_cat — one K=2D MXU push per step.
                lhs = jnp.concatenate([h[l - 1], h[l]], axis=-1)     # (B, 2D)
                gates = jnp.dot(
                    lhs, wcat[l - 1], preferred_element_type=f32) + bcat[l - 1]

            # One EUP push for all four gate regions: [f | i | o | g].
            act = jnp.tanh(gates * g_scale) * g_scale + g_shift

            f_g = act[:, 0:D]            # forget gate at lane offset 0 (no rotate)
            i_g = act[:, D:2 * D]
            o_g = act[:, 2 * D:3 * D]
            g_g = act[:, 3 * D:4 * D]
            c[l] = f_g * c[l] + i_g * g_g
            h[l] = o_g * jnp.tanh(c[l])

    # Head: lane-padded matvec -> lane-dense (B, 128) store.
    out_ref[...] = (
        jnp.dot(h[L - 1], hw_ref[...], preferred_element_type=jnp.float32)
        + hb_ref[...]
    )


def prepare_params(params):
    """One-time host-side weight prep:
       - reorder gate rows [i,f,g,o] -> [f,i,o,g] (forget gate at lane 0),
       - fold the embedding + layer-0 input projection + bias into a (3, 4D)
         per-token gate table,
       - fuse [W_ih^T ; W_hh^T] per layer >= 1 into one (2D, 4D) weight,
       - lane-pad the head to 128 for a lane-dense output store."""
    emb, w_ih, w_hh, b, head_w, head_b = params
    L, fourD, D = w_ih.shape
    perm = jnp.concatenate([
        jnp.arange(D, 2 * D),       # f
        jnp.arange(0, D),           # i
        jnp.arange(3 * D, 4 * D),   # o
        jnp.arange(2 * D, 3 * D),   # g
    ])
    w_ih_t = jnp.transpose(w_ih[:, perm, :], (0, 2, 1))            # (L, D, 4D)
    w_hh_t = jnp.transpose(w_hh[:, perm, :], (0, 2, 1))            # (L, D, 4D)
    b_p = b[:, perm]                                               # (L, 4D)

    table0 = emb.astype(jnp.float32) @ w_ih_t[0] + b_p[0]          # (3, 4D)
    whh0 = w_hh_t[0]                                               # (D, 4D)
    # Layers >= 2 of the stack (note: assumes num_layers >= 2, as in arch "32-2").
    wcat = jnp.concatenate([w_ih_t[1:], w_hh_t[1:]], axis=1)       # (L-1, 2D, 4D)
    bcat = b_p[1:, None, :]                                        # (L-1, 1, 4D)

    hw_pad = jnp.zeros((D, 128), jnp.float32).at[:, 0].set(head_w[0])
    hb_pad = jnp.zeros((1, 128), jnp.float32).at[0, 0].set(head_b[0, 0])
    return table0, whh0, wcat, bcat, hw_pad, hb_pad


def simple_lstm_forward(tokens, prepped):
    table0, whh0, wcat, bcat, hw_pad, hb_pad = prepped
    B = tokens.shape[0]
    D = whh0.shape[0]
    L = wcat.shape[0] + 1

    # cls token append (plain-XLA glue).
    cls_tok = jnp.full((B, 1), 2, dtype=tokens.dtype)
    x_tok = jnp.concatenate([tokens, cls_tok], axis=1)             # (B, T)
    T = x_tok.shape[1]

    # Batch tile for the parallel grid axis (multiple of 8 f32 sublanes).
    Bp = max(8, ((B + 7) // 8) * 8)
    bt = min(Bp, 256)                       # per-core batch tile; VMEM-safe on v7x
    Bp = ((Bp + bt - 1) // bt) * bt
    if Bp != B:
        x_tok = jnp.pad(x_tok, ((0, Bp - B), (0, 0)))              # pad w/ token 0

    # Layer-0 gate pre-activations via a 3-row table gather (vocab = {0,1,2}).
    gx0 = jnp.take(table0, x_tok, axis=0)                          # (Bp, T, 4D)
    gx0 = jnp.transpose(gx0, (1, 0, 2))                            # (T, Bp, 4D)

    kernel = functools.partial(_lstm_head_kernel, T, bt, D, L)
    out = pl.pallas_call(
        kernel,
        out_shape=jax.ShapeDtypeStruct((Bp, 128), jnp.float32),
        grid=(Bp // bt,),
        in_specs=[
            pl.BlockSpec((T, bt, 4 * D), lambda i: (0, i, 0)),     # gx0: batch-tiled
            pl.BlockSpec((D, 4 * D), lambda i: (0, 0)),            # whh0: resident
            pl.BlockSpec(wcat.shape, lambda i: (0, 0, 0)),         # wcat: resident
            pl.BlockSpec(bcat.shape, lambda i: (0, 0, 0)),         # bcat: resident
            pl.BlockSpec((D, 128), lambda i: (0, 0)),              # head w
            pl.BlockSpec((1, 128), lambda i: (0, 0)),              # head b
        ],
        out_specs=pl.BlockSpec((bt, 128), lambda i: (i, 0)),       # lane-dense
        compiler_params=pltpu.CompilerParams(
            dimension_semantics=("parallel",)),
    )(gx0, whh0, wcat, bcat, hw_pad, hb_pad)
    return out[:B, 0]                                              # (B,)


def reference_forward(tokens, params):
    """Pure-JAX reference mirroring the PyTorch module math (gate order i,f,g,o)."""
    emb, w_ih, w_hh, b, head_w, head_b = params
    B = tokens.shape[0]
    L, fourD, D = w_ih.shape
    cls_tok = jnp.full((B, 1), 2, dtype=tokens.dtype)
    x_tok = jnp.concatenate([tokens, cls_tok], axis=1)
    x = emb[x_tok].astype(jnp.float32)                             # (B, T, D)
    T = x.shape[1]
    for l in range(L):
        h = jnp.zeros((B, D), jnp.float32)
        c = jnp.zeros((B, D), jnp.float32)
        outs = []
        for t in range(T):
            gates = x[:, t] @ w_ih[l].T + h @ w_hh[l].T + b[l]
            i = jax.nn.sigmoid(gates[:, 0:D])
            f = jax.nn.sigmoid(gates[:, D:2 * D])
            g = jnp.tanh(gates[:, 2 * D:3 * D])
            o = jax.nn.sigmoid(gates[:, 3 * D:4 * D])
            c = f * c + i * g
            h = o * jnp.tanh(c)
            outs.append(h)
        x = jnp.stack(outs, axis=1)
    y = x[:, -1] @ head_w.T + head_b                               # (B, 1)
    return y[:, 0]


def init_params(key, d_model, num_layers, shrink):
    """Deterministic synthetic parameters (shapes match nn.Embedding / nn.LSTM /
    nn.Linear in the module), all scaled by `shrink` like the PyTorch __init__."""
    D = d_model
    k = 1.0 / np.sqrt(D)
    keys = jax.random.split(key, 2 + 4 * num_layers + 2)
    it = iter(keys)

    emb = jax.random.normal(next(it), (3, D), jnp.float32)         # nn.Embedding(3, D)

    w_ih, w_hh, bias = [], [], []
    for _ in range(num_layers):
        w_ih.append(jax.random.uniform(next(it), (4 * D, D), jnp.float32, -k, k))
        w_hh.append(jax.random.uniform(next(it), (4 * D, D), jnp.float32, -k, k))
        b_ih = jax.random.uniform(next(it), (4 * D,), jnp.float32, -k, k)
        b_hh = jax.random.uniform(next(it), (4 * D,), jnp.float32, -k, k)
        bias.append(b_ih + b_hh)           # s*b_ih + s*b_hh == s*(b_ih + b_hh)
    w_ih = jnp.stack(w_ih)                                         # (L, 4D, D)
    w_hh = jnp.stack(w_hh)                                         # (L, 4D, D)
    bias = jnp.stack(bias)                                         # (L, 4D)

    head_w = jax.random.uniform(next(it), (1, D), jnp.float32, -k, k)  # nn.Linear(D, 1)
    head_b = jax.random.uniform(next(it), (1, 1), jnp.float32, -k, k)

    s = jnp.float32(shrink)
    return (emb * s, w_ih * s, w_hh * s, bias * s, head_w * s, head_b * s)


if __name__ == "__main__":
    # simpleLSTM(max_len=8, arch="32-2", shrink=0.9)
    max_len, d_model, num_layers, shrink = 8, 32, 2, 0.9
    batch = 2

    root = jax.random.PRNGKey(0)
    k_params, k_tok = jax.random.split(root)
    raw_params = init_params(k_params, d_model, num_layers, shrink)
    prepped = prepare_params(raw_params)

    # inputs: (B, max_len) tokens in {0, 1}; cls token value 2 appended inside.
    tokens = jax.random.randint(k_tok, (batch, max_len), 0, 2, dtype=jnp.int32)

    out = jax.jit(simple_lstm_forward)(tokens, prepped)
    out = jax.block_until_ready(out)

    ref = reference_forward(tokens, raw_params)
    np.testing.assert_allclose(np.asarray(out), np.asarray(ref), rtol=1e-5, atol=1e-5)

    assert out.shape == (batch,)
    print("KERNEL_OK")
</pallas_src>

<mosaic_0001>
module attributes {stable_mosaic.version = 11 : i64} {
  func.func @_lstm_head_kernel(%arg0: i32, %arg1: memref<9x8x128xf32, #tpu.memory_space<vmem>>, %arg2: memref<32x128xf32, #tpu.memory_space<vmem>>, %arg3: memref<1x64x128xf32, #tpu.memory_space<vmem>>, %arg4: memref<1x1x128xf32, #tpu.memory_space<vmem>>, %arg5: memref<32x128xf32, #tpu.memory_space<vmem>>, %arg6: memref<1x128xf32, #tpu.memory_space<vmem>>, %arg7: memref<8x128xf32, #tpu.memory_space<vmem>>) attributes {dimension_semantics = [#tpu.dimension_semantics<parallel>], iteration_bounds = array<i64: 1>, scalar_prefetch = 0 : i64, scratch_operands = 0 : i64, tpu.core_type = #tpu.core_type<tc>, window_params = [{transform_indices = @transform_0, window_bounds = array<i64: 9, 8, 128>}, {pipeline_mode = #tpu.pipeline_mode<synchronous>, transform_indices = @transform_1, window_bounds = array<i64: 32, 128>}, {pipeline_mode = #tpu.pipeline_mode<synchronous>, transform_indices = @transform_2, window_bounds = array<i64: 1, 64, 128>}, {pipeline_mode = #tpu.pipeline_mode<synchronous>, transform_indices = @transform_3, window_bounds = array<i64: 1, 1, 128>}, {pipeline_mode = #tpu.pipeline_mode<synchronous>, transform_indices = @transform_4, window_bounds = array<i64: 32, 128>}, {pipeline_mode = #tpu.pipeline_mode<synchronous>, transform_indices = @transform_5, window_bounds = array<i64: 1, 128>}, {transform_indices = @transform_6, window_bounds = array<i64: 8, 128>}]} {
    %0 = tpu.iota {dimensions = array<i32: 1>} : vector<1x128xi32>
    %c96_i32 = arith.constant 96 : i32
    %1 = vector.broadcast %c96_i32 : i32 to vector<1x128xi32>
    %2 = arith.cmpi sge, %0, %1 : vector<1x128xi32>
    %cst = arith.constant 1.000000e+00 : f32
    %cst_0 = arith.constant 5.000000e-01 : f32
    %3 = vector.broadcast %cst : f32 to vector<1x128xf32>
    %4 = vector.broadcast %cst_0 : f32 to vector<1x128xf32>
    %5 = arith.select %2, %3, %4 : vector<1x128xi1>, vector<1x128xf32>
    %cst_1 = arith.constant 0.000000e+00 : f32
    %cst_2 = arith.constant 5.000000e-01 : f32
    %6 = vector.broadcast %cst_1 : f32 to vector<1x128xf32>
    %7 = vector.broadcast %cst_2 : f32 to vector<1x128xf32>
    %8 = arith.select %2, %6, %7 : vector<1x128xi1>, vector<1x128xf32>
    %c0 = arith.constant 0 : index
    %c0_3 = arith.constant 0 : index
    %9 = vector.load %arg2[%c0, %c0_3] : memref<32x128xf32, #tpu.memory_space<vmem>>, vector<32x128xf32>
    %c0_4 = arith.constant 0 : index
    %c0_5 = arith.constant 0 : index
    %c0_6 = arith.constant 0 : index
    %10 = vector.load %arg3[%c0_4, %c0_5, %c0_6] : memref<1x64x128xf32, #tpu.memory_space<vmem>>, vector<1x64x128xf32>
    %11 = vector.shape_cast %10 : vector<1x64x128xf32> to vector<64x128xf32>
    %c0_7 = arith.constant 0 : index
    %c0_8 = arith.constant 0 : index
    %c0_9 = arith.constant 0 : index
    %12 = vector.load %arg4[%c0_7, %c0_8, %c0_9] : memref<1x1x128xf32, #tpu.memory_space<vmem>>, vector<1x1x128xf32>
    %13 = vector.shape_cast %12 : vector<1x1x128xf32> to vector<1x128xf32>
    %cst_10 = arith.constant 0.000000e+00 : f32
    %14 = vector.broadcast %cst_10 : f32 to vector<8x32xf32>
    %cst_11 = arith.constant 0.000000e+00 : f32
    %15 = vector.broadcast %cst_11 : f32 to vector<8x32xf32>
    %cst_12 = arith.constant 0.000000e+00 : f32
    %16 = vector.broadcast %cst_12 : f32 to vector<8x32xf32>
    %cst_13 = arith.constant 0.000000e+00 : f32
    %17 = vector.broadcast %cst_13 : f32 to vector<8x32xf32>
    %c0_14 = arith.constant 0 : index
    %c0_15 = arith.constant 0 : index
    %c0_16 = arith.constant 0 : index
    %18 = vector.load %arg1[%c0_14, %c0_15, %c0_16] : memref<9x8x128xf32, #tpu.memory_space<vmem>>, vector<1x8x128xf32>
    %19 = vector.shape_cast %18 : vector<1x8x128xf32> to vector<8x128xf32>
    %cst_17 = arith.constant dense<0.000000e+00> : vector<8x128xf32>
    %20 = tpu.matmul %14, %9, %cst_17 {dimension_numbers = #tpu.dot_dimension_numbers<[1], [0], [0], [1], [0, 0, 1, 1], [], []>} : vector<8x32xf32>, vector<32x128xf32>, vector<8x128xf32> -> vector<8x128xf32>
    %21 = arith.addf %19, %20 : vector<8x128xf32>
    %22 = vector.broadcast %5 : vector<1x128xf32> to vector<8x128xf32>
    %23 = arith.mulf %21, %22 : vector<8x128xf32>
    %24 = math.tanh %23 : vector<8x128xf32>
    %25 = vector.broadcast %5 : vector<1x128xf32> to vector<8x128xf32>
    %26 = arith.mulf %24, %25 : vector<8x128xf32>
    %27 = vector.broadcast %8 : vector<1x128xf32> to vector<8x128xf32>
    %28 = arith.addf %26, %27 : vector<8x128xf32>
    %29 = vector.extract_strided_slice %28 {offsets = [0, 0], sizes = [8, 32], strides = [1, 1]} : vector<8x128xf32> to vector<8x32xf32>
    %30 = vector.extract_strided_slice %28 {offsets = [0, 32], sizes = [8, 32], strides = [1, 1]} : vector<8x128xf32> to vector<8x32xf32>
    %31 = vector.extract_strided_slice %28 {offsets = [0, 64], sizes = [8, 32], strides = [1, 1]} : vector<8x128xf32> to vector<8x32xf32>
    %32 = vector.extract_strided_slice %28 {offsets = [0, 96], sizes = [8, 32], strides = [1, 1]} : vector<8x128xf32> to vector<8x32xf32>
    %33 = arith.mulf %29, %16 : vector<8x32xf32>
    %34 = arith.mulf %30, %32 : vector<8x32xf32>
    %35 = arith.addf %33, %34 : vector<8x32xf32>
    %36 = math.tanh %35 : vector<8x32xf32>
    %37 = arith.mulf %31, %36 : vector<8x32xf32>
    %38 = tpu.concatenate %37, %15 in 1 : vector<8x32xf32>, vector<8x32xf32> -> vector<8x64xf32>
    %cst_18 = arith.constant dense<0.000000e+00> : vector<8x128xf32>
    %39 = tpu.matmul %38, %11, %cst_18 {dimension_numbers = #tpu.dot_dimension_numbers<[1], [0], [0], [1], [0, 0, 1, 1], [], []>} : vector<8x64xf32>, vector<64x128xf32>, vector<8x128xf32> -> vector<8x128xf32>
    %40 = vector.broadcast %13 : vector<1x128xf32> to vector<8x128xf32>
    %41 = arith.addf %39, %40 : vector<8x128xf32>
    %42 = vector.broadcast %5 : vector<1x128xf32> to vector<8x128xf32>
    %43 = arith.mulf %41, %42 : vector<8x128xf32>
    %44 = math.tanh %43 : vector<8x128xf32>
    %45 = vector.broadcast %5 : vector<1x128xf32> to vector<8x128xf32>
    %46 = arith.mulf %44, %45 : vector<8x128xf32>
    %47 = vector.broadcast %8 : vector<1x128xf32> to vector<8x128xf32>
    %48 = arith.addf %46, %47 : vector<8x128xf32>
    %49 = vector.extract_strided_slice %48 {offsets = [0, 0], sizes = [8, 32], strides = [1, 1]} : vector<8x128xf32> to vector<8x32xf32>
    %50 = vector.extract_strided_slice %48 {offsets = [0, 32], sizes = [8, 32], strides = [1, 1]} : vector<8x128xf32> to vector<8x32xf32>
    %51 = vector.extract_strided_slice %48 {offsets = [0, 64], sizes = [8, 32], strides = [1, 1]} : vector<8x128xf32> to vector<8x32xf32>
    %52 = vector.extract_strided_slice %48 {offsets = [0, 96], sizes = [8, 32], strides = [1, 1]} : vector<8x128xf32> to vector<8x32xf32>
    %53 = arith.mulf %49, %17 : vector<8x32xf32>
    %54 = arith.mulf %50, %52 : vector<8x32xf32>
    %55 = arith.addf %53, %54 : vector<8x32xf32>
    %56 = math.tanh %55 : vector<8x32xf32>
    %57 = arith.mulf %51, %56 : vector<8x32xf32>
    %c1 = arith.constant 1 : index
    %c0_19 = arith.constant 0 : index
    %c0_20 = arith.constant 0 : index
    %58 = vector.load %arg1[%c1, %c0_19, %c0_20] : memref<9x8x128xf32, #tpu.memory_space<vmem>>, vector<1x8x128xf32>
    %59 = vector.shape_cast %58 : vector<1x8x128xf32> to vector<8x128xf32>
    %cst_21 = arith.constant dense<0.000000e+00> : vector<8x128xf32>
    %60 = tpu.matmul %37, %9, %cst_21 {dimension_numbers = #tpu.dot_dimension_numbers<[1], [0], [0], [1], [0, 0, 1, 1], [], []>} : vector<8x32xf32>, vector<32x128xf32>, vector<8x128xf32> -> vector<8x128xf32>
    %61 = arith.addf %59, %60 : vector<8x128xf32>
    %62 = vector.broadcast %5 : vector<1x128xf32> to vector<8x128xf32>
    %63 = arith.mulf %61, %62 : vector<8x128xf32>
    %64 = math.tanh %63 : vector<8x128xf32>
    %65 = vector.broadcast %5 : vector<1x128xf32> to vector<8x128xf32>
    %66 = arith.mulf %64, %65 : vector<8x128xf32>
    %67 = vector.broadcast %8 : vector<1x128xf32> to vector<8x128xf32>
    %68 = arith.addf %66, %67 : vector<8x128xf32>
    %69 = vector.extract_strided_slice %68 {offsets = [0, 0], sizes = [8, 32], strides = [1, 1]} : vector<8x128xf32> to vector<8x32xf32>
    %70 = vector.extract_strided_slice %68 {offsets = [0, 32], sizes = [8, 32], strides = [1, 1]} : vector<8x128xf32> to vector<8x32xf32>
    %71 = vector.extract_strided_slice %68 {offsets = [0, 64], sizes = [8, 32], strides = [1, 1]} : vector<8x128xf32> to vector<8x32xf32>
    %72 = vector.extract_strided_slice %68 {offsets = [0, 96], sizes = [8, 32], strides = [1, 1]} : vector<8x128xf32> to vector<8x32xf32>
    %73 = arith.mulf %69, %35 : vector<8x32xf32>
    %74 = arith.mulf %70, %72 : vector<8x32xf32>
    %75 = arith.addf %73, %74 : vector<8x32xf32>
    %76 = math.tanh %75 : vector<8x32xf32>
    %77 = arith.mulf %71, %76 : vector<8x32xf32>
    %78 = tpu.concatenate %77, %57 in 1 : vector<8x32xf32>, vector<8x32xf32> -> vector<8x64xf32>
    %cst_22 = arith.constant dense<0.000000e+00> : vector<8x128xf32>
    %79 = tpu.matmul %78, %11, %cst_22 {dimension_numbers = #tpu.dot_dimension_numbers<[1], [0], [0], [1], [0, 0, 1, 1], [], []>} : vector<8x64xf32>, vector<64x128xf32>, vector<8x128xf32> -> vector<8x128xf32>
    %80 = vector.broadcast %13 : vector<1x128xf32> to vector<8x128xf32>
    %81 = arith.addf %79, %80 : vector<8x128xf32>
    %82 = vector.broadcast %5 : vector<1x128xf32> to vector<8x128xf32>
    %83 = arith.mulf %81, %82 : vector<8x128xf32>
    %84 = math.tanh %83 : vector<8x128xf32>
    %85 = vector.broadcast %5 : vector<1x128xf32> to vector<8x128xf32>
    %86 = arith.mulf %84, %85 : vector<8x128xf32>
    %87 = vector.broadcast %8 : vector<1x128xf32> to vector<8x128xf32>
    %88 = arith.addf %86, %87 : vector<8x128xf32>
    %89 = vector.extract_strided_slice %88 {offsets = [0, 0], sizes = [8, 32], strides = [1, 1]} : vector<8x128xf32> to vector<8x32xf32>
    %90 = vector.extract_strided_slice %88 {offsets = [0, 32], sizes = [8, 32], strides = [1, 1]} : vector<8x128xf32> to vector<8x32xf32>
    %91 = vector.extract_strided_slice %88 {offsets = [0, 64], sizes = [8, 32], strides = [1, 1]} : vector<8x128xf32> to vector<8x32xf32>
    %92 = vector.extract_strided_slice %88 {offsets = [0, 96], sizes = [8, 32], strides = [1, 1]} : vector<8x128xf32> to vector<8x32xf32>
    %93 = arith.mulf %89, %55 : vector<8x32xf32>
    %94 = arith.mulf %90, %92 : vector<8x32xf32>
    %95 = arith.addf %93, %94 : vector<8x32xf32>
    %96 = math.tanh %95 : vector<8x32xf32>
    %97 = arith.mulf %91, %96 : vector<8x32xf32>
    %c2 = arith.constant 2 : index
    %c0_23 = arith.constant 0 : index
    %c0_24 = arith.constant 0 : index
    %98 = vector.load %arg1[%c2, %c0_23, %c0_24] : memref<9x8x128xf32, #tpu.memory_space<vmem>>, vector<1x8x128xf32>
    %99 = vector.shape_cast %98 : vector<1x8x128xf32> to vector<8x128xf32>
    %cst_25 = arith.constant dense<0.000000e+00> : vector<8x128xf32>
    %100 = tpu.matmul %77, %9, %cst_25 {dimension_numbers = #tpu.dot_dimension_numbers<[1], [0], [0], [1], [0, 0, 1, 1], [], []>} : vector<8x32xf32>, vector<32x128xf32>, vector<8x128xf32> -> vector<8x128xf32>
    %101 = arith.addf %99, %100 : vector<8x128xf32>
    %102 = vector.broadcast %5 : vector<1x128xf32> to vector<8x128xf32>
    %103 = arith.mulf %101, %102 : vector<8x128xf32>
    %104 = math.tanh %103 : vector<8x128xf32>
    %105 = vector.broadcast %5 : vector<1x128xf32> to vector<8x128xf32>
    %106 = arith.mulf %104, %105 : vector<8x128xf32>
    %107 = vector.broadcast %8 : vector<1x128xf32> to vector<8x128xf32>
    %108 = arith.addf %106, %107 : vector<8x128xf32>
    %109 = vector.extract_strided_slice %108 {offsets = [0, 0], sizes = [8, 32], strides = [1, 1]} : vector<8x128xf32> to vector<8x32xf32>
    %110 = vector.extract_strided_slice %108 {offsets = [0, 32], sizes = [8, 32], strides = [1, 1]} : vector<8x128xf32> to vector<8x32xf32>
    %111 = vector.extract_strided_slice %108 {offsets = [0, 64], sizes = [8, 32], strides = [1, 1]} : vector<8x128xf32> to vector<8x32xf32>
    %112 = vector.extract_strided_slice %108 {offsets = [0, 96], sizes = [8, 32], strides = [1, 1]} : vector<8x128xf32> to vector<8x32xf32>
    %113 = arith.mulf %109, %75 : vector<8x32xf32>
    %114 = arith.mulf %110, %112 : vector<8x32xf32>
    %115 = arith.addf %113, %114 : vector<8x32xf32>
    %116 = math.tanh %115 : vector<8x32xf32>
    %117 = arith.mulf %111, %116 : vector<8x32xf32>
    %118 = tpu.concatenate %117, %97 in 1 : vector<8x32xf32>, vector<8x32xf32> -> vector<8x64xf32>
    %cst_26 = arith.constant dense<0.000000e+00> : vector<8x128xf32>
    %119 = tpu.matmul %118, %11, %cst_26 {dimension_numbers = #tpu.dot_dimension_numbers<[1], [0], [0], [1], [0, 0, 1, 1], [], []>} : vector<8x64xf32>, vector<64x128xf32>, vector<8x128xf32> -> vector<8x128xf32>
    %120 = vector.broadcast %13 : vector<1x128xf32> to vector<8x128xf32>
    %121 = arith.addf %119, %120 : vector<8x128xf32>
    %122 = vector.broadcast %5 : vector<1x128xf32> to vector<8x128xf32>
    %123 = arith.mulf %121, %122 : vector<8x128xf32>
    %124 = math.tanh %123 : vector<8x128xf32>
    %125 = vector.broadcast %5 : vector<1x128xf32> to vector<8x128xf32>
    %126 = arith.mulf %124, %125 : vector<8x128xf32>
    %127 = vector.broadcast %8 : vector<1x128xf32> to vector<8x128xf32>
    %128 = arith.addf %126, %127 : vector<8x128xf32>
    %129 = vector.extract_strided_slice %128 {offsets = [0, 0], sizes = [8, 32], strides = [1, 1]} : vector<8x128xf32> to vector<8x32xf32>
    %130 = vector.extract_strided_slice %128 {offsets = [0, 32], sizes = [8, 32], strides = [1, 1]} : vector<8x128xf32> to vector<8x32xf32>
    %131 = vector.extract_strided_slice %128 {offsets = [0, 64], sizes = [8, 32], strides = [1, 1]} : vector<8x128xf32> to vector<8x32xf32>
    %132 = vector.extract_strided_slice %128 {offsets = [0, 96], sizes = [8, 32], strides = [1, 1]} : vector<8x128xf32> to vector<8x32xf32>
    %133 = arith.mulf %129, %95 : vector<8x32xf32>
    %134 = arith.mulf %130, %132 : vector<8x32xf32>
    %135 = arith.addf %133, %134 : vector<8x32xf32>
    %136 = math.tanh %135 : vector<8x32xf32>
    %137 = arith.mulf %131, %136 : vector<8x32xf32>
    %c3 = arith.constant 3 : index
    %c0_27 = arith.constant 0 : index
    %c0_28 = arith.constant 0 : index
    %138 = vector.load %arg1[%c3, %c0_27, %c0_28] : memref<9x8x128xf32, #tpu.memory_space<vmem>>, vector<1x8x128xf32>
    %139 = vector.shape_cast %138 : vector<1x8x128xf32> to vector<8x128xf32>
    %cst_29 = arith.constant dense<0.000000e+00> : vector<8x128xf32>
    %140 = tpu.matmul %117, %9, %cst_29 {dimension_numbers = #tpu.dot_dimension_numbers<[1], [0], [0], [1], [0, 0, 1, 1], [], []>} : vector<8x32xf32>, vector<32x128xf32>, vector<8x128xf32> -> vector<8x128xf32>
    %141 = arith.addf %139, %140 : vector<8x128xf32>
    %142 = vector.broadcast %5 : vector<1x128xf32> to vector<8x128xf32>
    %143 = arith.mulf %141, %142 : vector<8x128xf32>
    %144 = math.tanh %143 : vector<8x128xf32>
    %145 = vector.broadcast %5 : vector<1x128xf32> to vector<8x128xf32>
    %146 = arith.mulf %144, %145 : vector<8x128xf32>
    %147 = vector.broadcast %8 : vector<1x128xf32> to vector<8x128xf32>
    %148 = arith.addf %146, %147 : vector<8x128xf32>
    %149 = vector.extract_strided_slice %148 {offsets = [0, 0], sizes = [8, 32], strides = [1, 1]} : vector<8x128xf32> to vector<8x32xf32>
    %150 = vector.extract_strided_slice %148 {offsets = [0, 32], sizes = [8, 32], strides = [1, 1]} : vector<8x128xf32> to vector<8x32xf32>
    %151 = vector.extract_strided_slice %148 {offsets = [0, 64], sizes = [8, 32], strides = [1, 1]} : vector<8x128xf32> to vector<8x32xf32>
    %152 = vector.extract_strided_slice %148 {offsets = [0, 96], sizes = [8, 32], strides = [1, 1]} : vector<8x128xf32> to vector<8x32xf32>
    %153 = arith.mulf %149, %115 : vector<8x32xf32>
    %154 = arith.mulf %150, %152 : vector<8x32xf32>
    %155 = arith.addf %153, %154 : vector<8x32xf32>
    %156 = math.tanh %155 : vector<8x32xf32>
    %157 = arith.mulf %151, %156 : vector<8x32xf32>
    %158 = tpu.concatenate %157, %137 in 1 : vector<8x32xf32>, vector<8x32xf32> -> vector<8x64xf32>
    %cst_30 = arith.constant dense<0.000000e+00> : vector<8x128xf32>
    %159 = tpu.matmul %158, %11, %cst_30 {dimension_numbers = #tpu.dot_dimension_numbers<[1], [0], [0], [1], [0, 0, 1, 1], [], []>} : vector<8x64xf32>, vector<64x128xf32>, vector<8x128xf32> -> vector<8x128xf32>
    %160 = vector.broadcast %13 : vector<1x128xf32> to vector<8x128xf32>
    %161 = arith.addf %159, %160 : vector<8x128xf32>
    %162 = vector.broadcast %5 : vector<1x128xf32> to vector<8x128xf32>
    %163 = arith.mulf %161, %162 : vector<8x128xf32>
    %164 = math.tanh %163 : vector<8x128xf32>
    %165 = vector.broadcast %5 : vector<1x128xf32> to vector<8x128xf32>
    %166 = arith.mulf %164, %165 : vector<8x128xf32>
    %167 = vector.broadcast %8 : vector<1x128xf32> to vector<8x128xf32>
    %168 = arith.addf %166, %167 : vector<8x128xf32>
    %169 = vector.extract_strided_slice %168 {offsets = [0, 0], sizes = [8, 32], strides = [1, 1]} : vector<8x128xf32> to vector<8x32xf32>
    %170 = vector.extract_strided_slice %168 {offsets = [0, 32], sizes = [8, 32], strides = [1, 1]} : vector<8x128xf32> to vector<8x32xf32>
    %171 = vector.extract_strided_slice %168 {offsets = [0, 64], sizes = [8, 32], strides = [1, 1]} : vector<8x128xf32> to vector<8x32xf32>
    %172 = vector.extract_strided_slice %168 {offsets = [0, 96], sizes = [8, 32], strides = [1, 1]} : vector<8x128xf32> to vector<8x32xf32>
    %173 = arith.mulf %169, %135 : vector<8x32xf32>
    %174 = arith.mulf %170, %172 : vector<8x32xf32>
    %175 = arith.addf %173, %174 : vector<8x32xf32>
    %176 = math.tanh %175 : vector<8x32xf32>
    %177 = arith.mulf %171, %176 : vector<8x32xf32>
    %c4 = arith.constant 4 : index
    %c0_31 = arith.constant 0 : index
    %c0_32 = arith.constant 0 : index
    %178 = vector.load %arg1[%c4, %c0_31, %c0_32] : memref<9x8x128xf32, #tpu.memory_space<vmem>>, vector<1x8x128xf32>
    %179 = vector.shape_cast %178 : vector<1x8x128xf32> to vector<8x128xf32>
    %cst_33 = arith.constant dense<0.000000e+00> : vector<8x128xf32>
    %180 = tpu.matmul %157, %9, %cst_33 {dimension_numbers = #tpu.dot_dimension_numbers<[1], [0], [0], [1], [0, 0, 1, 1], [], []>} : vector<8x32xf32>, vector<32x128xf32>, vector<8x128xf32> -> vector<8x128xf32>
    %181 = arith.addf %179, %180 : vector<8x128xf32>
    %182 = vector.broadcast %5 : vector<1x128xf32> to vector<8x128xf32>
    %183 = arith.mulf %181, %182 : vector<8x128xf32>
    %184 = math.tanh %183 : vector<8x128xf32>
    %185 = vector.broadcast %5 : vector<1x128xf32> to vector<8x128xf32>
    %186 = arith.mulf %184, %185 : vector<8x128xf32>
    %187 = vector.broadcast %8 : vector<1x128xf32> to vector<8x128xf32>
    %188 = arith.addf %186, %187 : vector<8x128xf32>
    %189 = vector.extract_strided_slice %188 {offsets = [0, 0], sizes = [8, 32], strides = [1, 1]} : vector<8x128xf32> to vector<8x32xf32>
    %190 = vector.extract_strided_slice %188 {offsets = [0, 32], sizes = [8, 32], strides = [1, 1]} : vector<8x128xf32> to vector<8x32xf32>
    %191 = vector.extract_strided_slice %188 {offsets = [0, 64], sizes = [8, 32], strides = [1, 1]} : vector<8x128xf32> to vector<8x32xf32>
    %192 = vector.extract_strided_slice %188 {offsets = [0, 96], sizes = [8, 32], strides = [1, 1]} : vector<8x128xf32> to vector<8x32xf32>
    %193 = arith.mulf %189, %155 : vector<8x32xf32>
    %194 = arith.mulf %190, %192 : vector<8x32xf32>
    %195 = arith.addf %193, %194 : vector<8x32xf32>
    %196 = math.tanh %195 : vector<8x32xf32>
    %197 = arith.mulf %191, %196 : vector<8x32xf32>
    %198 = tpu.concatenate %197, %177 in 1 : vector<8x32xf32>, vector<8x32xf32> -> vector<8x64xf32>
    %cst_34 = arith.constant dense<0.000000e+00> : vector<8x128xf32>
    %199 = tpu.matmul %198, %11, %cst_34 {dimension_numbers = #tpu.dot_dimension_numbers<[1], [0], [0], [1], [0, 0, 1, 1], [], []>} : vector<8x64xf32>, vector<64x128xf32>, vector<8x128xf32> -> vector<8x128xf32>
    %200 = vector.broadcast %13 : vector<1x128xf32> to vector<8x128xf32>
    %201 = arith.addf %199, %200 : vector<8x128xf32>
    %202 = vector.broadcast %5 : vector<1x128xf32> to vector<8x128xf32>
    %203 = arith.mulf %201, %202 : vector<8x128xf32>
    %204 = math.tanh %203 : vector<8x128xf32>
    %205 = vector.broadcast %5 : vector<1x128xf32> to vector<8x128xf32>
    %206 = arith.mulf %204, %205 : vector<8x128xf32>
    %207 = vector.broadcast %8 : vector<1x128xf32> to vector<8x128xf32>
    %208 = arith.addf %206, %207 : vector<8x128xf32>
    %209 = vector.extract_strided_slice %208 {offsets = [0, 0], sizes = [8, 32], strides = [1, 1]} : vector<8x128xf32> to vector<8x32xf32>
    %210 = vector.extract_strided_slice %208 {offsets = [0, 32], sizes = [8, 32], strides = [1, 1]} : vector<8x128xf32> to vector<8x32xf32>
    %211 = vector.extract_strided_slice %208 {offsets = [0, 64], sizes = [8, 32], strides = [1, 1]} : vector<8x128xf32> to vector<8x32xf32>
    %212 = vector.extract_strided_slice %208 {offsets = [0, 96], sizes = [8, 32], strides = [1, 1]} : vector<8x128xf32> to vector<8x32xf32>
    %213 = arith.mulf %209, %175 : vector<8x32xf32>
    %214 = arith.mulf %210, %212 : vector<8x32xf32>
    %215 = arith.addf %213, %214 : vector<8x32xf32>
    %216 = math.tanh %215 : vector<8x32xf32>
    %217 = arith.mulf %211, %216 : vector<8x32xf32>
    %c5 = arith.constant 5 : index
    %c0_35 = arith.constant 0 : index
    %c0_36 = arith.constant 0 : index
    %218 = vector.load %arg1[%c5, %c0_35, %c0_36] : memref<9x8x128xf32, #tpu.memory_space<vmem>>, vector<1x8x128xf32>
    %219 = vector.shape_cast %218 : vector<1x8x128xf32> to vector<8x128xf32>
    %cst_37 = arith.constant dense<0.000000e+00> : vector<8x128xf32>
    %220 = tpu.matmul %197, %9, %cst_37 {dimension_numbers = #tpu.dot_dimension_numbers<[1], [0], [0], [1], [0, 0, 1, 1], [], []>} : vector<8x32xf32>, vector<32x128xf32>, vector<8x128xf32> -> vector<8x128xf32>
    %221 = arith.addf %219, %220 : vector<8x128xf32>
    %222 = vector.broadcast %5 : vector<1x128xf32> to vector<8x128xf32>
    %223 = arith.mulf %221, %222 : vector<8x128xf32>
    %224 = math.tanh %223 : vector<8x128xf32>
    %225 = vector.broadcast %5 : vector<1x128xf32> to vector<8x128xf32>
    %226 = arith.mulf %224, %225 : vector<8x128xf32>
    %227 = vector.broadcast %8 : vector<1x128xf32> to vector<8x128xf32>
    %228 = arith.addf %226, %227 : vector<8x128xf32>
    %229 = vector.extract_strided_slice %228 {offsets = [0, 0], sizes = [8, 32], strides = [1, 1]} : vector<8x128xf32> to vector<8x32xf32>
    %230 = vector.extract_strided_slice %228 {offsets = [0, 32], sizes = [8, 32], strides = [1, 1]} : vector<8x128xf32> to vector<8x32xf32>
    %231 = vector.extract_strided_slice %228 {offsets = [0, 64], sizes = [8, 32], strides = [1, 1]} : vector<8x128xf32> to vector<8x32xf32>
    %232 = vector.extract_strided_slice %228 {offsets = [0, 96], sizes = [8, 32], strides = [1, 1]} : vector<8x128xf32> to vector<8x32xf32>
    %233 = arith.mulf %229, %195 : vector<8x32xf32>
    %234 = arith.mulf %230, %232 : vector<8x32xf32>
    %235 = arith.addf %233, %234 : vector<8x32xf32>
    %236 = math.tanh %235 : vector<8x32xf32>
    %237 = arith.mulf %231, %236 : vector<8x32xf32>
    %238 = tpu.concatenate %237, %217 in 1 : vector<8x32xf32>, vector<8x32xf32> -> vector<8x64xf32>
    %cst_38 = arith.constant dense<0.000000e+00> : vector<8x128xf32>
    %239 = tpu.matmul %238, %11, %cst_38 {dimension_numbers = #tpu.dot_dimension_numbers<[1], [0], [0], [1], [0, 0, 1, 1], [], []>} : vector<8x64xf32>, vector<64x128xf32>, vector<8x128xf32> -> vector<8x128xf32>
    %240 = vector.broadcast %13 : vector<1x128xf32> to vector<8x128xf32>
    %241 = arith.addf %239, %240 : vector<8x128xf32>
    %242 = vector.broadcast %5 : vector<1x128xf32> to vector<8x128xf32>
    %243 = arith.mulf %241, %242 : vector<8x128xf32>
    %244 = math.tanh %243 : vector<8x128xf32>
    %245 = vector.broadcast %5 : vector<1x128xf32> to vector<8x128xf32>
    %246 = arith.mulf %244, %245 : vector<8x128xf32>
    %247 = vector.broadcast %8 : vector<1x128xf32> to vector<8x128xf32>
    %248 = arith.addf %246, %247 : vector<8x128xf32>
    %249 = vector.extract_strided_slice %248 {offsets = [0, 0], sizes = [8, 32], strides = [1, 1]} : vector<8x128xf32> to vector<8x32xf32>
    %250 = vector.extract_strided_slice %248 {offsets = [0, 32], sizes = [8, 32], strides = [1, 1]} : vector<8x128xf32> to vector<8x32xf32>
    %251 = vector.extract_strided_slice %248 {offsets = [0, 64], sizes = [8, 32], strides = [1, 1]} : vector<8x128xf32> to vector<8x32xf32>
    %252 = vector.extract_strided_slice %248 {offsets = [0, 96], sizes = [8, 32], strides = [1, 1]} : vector<8x128xf32> to vector<8x32xf32>
    %253 = arith.mulf %249, %215 : vector<8x32xf32>
    %254 = arith.mulf %250, %252 : vector<8x32xf32>
    %255 = arith.addf %253, %254 : vector<8x32xf32>
    %256 = math.tanh %255 : vector<8x32xf32>
    %257 = arith.mulf %251, %256 : vector<8x32xf32>
    %c6 = arith.constant 6 : index
    %c0_39 = arith.constant 0 : index
    %c0_40 = arith.constant 0 : index
    %258 = vector.load %arg1[%c6, %c0_39, %c0_40] : memref<9x8x128xf32, #tpu.memory_space<vmem>>, vector<1x8x128xf32>
    %259 = vector.shape_cast %258 : vector<1x8x128xf32> to vector<8x128xf32>
    %cst_41 = arith.constant dense<0.000000e+00> : vector<8x128xf32>
    %260 = tpu.matmul %237, %9, %cst_41 {dimension_numbers = #tpu.dot_dimension_numbers<[1], [0], [0], [1], [0, 0, 1, 1], [], []>} : vector<8x32xf32>, vector<32x128xf32>, vector<8x128xf32> -> vector<8x128xf32>
    %261 = arith.addf %259, %260 : vector<8x128xf32>
    %262 = vector.broadcast %5 : vector<1x128xf32> to vector<8x128xf32>
    %263 = arith.mulf %261, %262 : vector<8x128xf32>
    %264 = math.tanh %263 : vector<8x128xf32>
    %265 = vector.broadcast %5 : vector<1x128xf32> to vector<8x128xf32>
    %266 = arith.mulf %264, %265 : vector<8x128xf32>
    %267 = vector.broadcast %8 : vector<1x128xf32> to vector<8x128xf32>
    %268 = arith.addf %266, %267 : vector<8x128xf32>
    %269 = vector.extract_strided_slice %268 {offsets = [0, 0], sizes = [8, 32], strides = [1, 1]} : vector<8x128xf32> to vector<8x32xf32>
    %270 = vector.extract_strided_slice %268 {offsets = [0, 32], sizes = [8, 32], strides = [1, 1]} : vector<8x128xf32> to vector<8x32xf32>
    %271 = vector.extract_strided_slice %268 {offsets = [0, 64], sizes = [8, 32], strides = [1, 1]} : vector<8x128xf32> to vector<8x32xf32>
    %272 = vector.extract_strided_slice %268 {offsets = [0, 96], sizes = [8, 32], strides = [1, 1]} : vector<8x128xf32> to vector<8x32xf32>
    %273 = arith.mulf %269, %235 : vector<8x32xf32>
    %274 = arith.mulf %270, %272 : vector<8x32xf32>
    %275 = arith.addf %273, %274 : vector<8x32xf32>
    %276 = math.tanh %275 : vector<8x32xf32>
    %277 = arith.mulf %271, %276 : vector<8x32xf32>
    %278 = tpu.concatenate %277, %257 in 1 : vector<8x32xf32>, vector<8x32xf32> -> vector<8x64xf32>
    %cst_42 = arith.constant dense<0.000000e+00> : vector<8x128xf32>
    %279 = tpu.matmul %278, %11, %cst_42 {dimension_numbers = #tpu.dot_dimension_numbers<[1], [0], [0], [1], [0, 0, 1, 1], [], []>} : vector<8x64xf32>, vector<64x128xf32>, vector<8x128xf32> -> vector<8x128xf32>
    %280 = vector.broadcast %13 : vector<1x128xf32> to vector<8x128xf32>
    %281 = arith.addf %279, %280 : vector<8x128xf32>
    %282 = vector.broadcast %5 : vector<1x128xf32> to vector<8x128xf32>
    %283 = arith.mulf %281, %282 : vector<8x128xf32>
    %284 = math.tanh %283 : vector<8x128xf32>
    %285 = vector.broadcast %5 : vector<1x128xf32> to vector<8x128xf32>
    %286 = arith.mulf %284, %285 : vector<8x128xf32>
    %287 = vector.broadcast %8 : vector<1x128xf32> to vector<8x128xf32>
    %288 = arith.addf %286, %287 : vector<8x128xf32>
    %289 = vector.extract_strided_slice %288 {offsets = [0, 0], sizes = [8, 32], strides = [1, 1]} : vector<8x128xf32> to vector<8x32xf32>
    %290 = vector.extract_strided_slice %288 {offsets = [0, 32], sizes = [8, 32], strides = [1, 1]} : vector<8x128xf32> to vector<8x32xf32>
    %291 = vector.extract_strided_slice %288 {offsets = [0, 64], sizes = [8, 32], strides = [1, 1]} : vector<8x128xf32> to vector<8x32xf32>
    %292 = vector.extract_strided_slice %288 {offsets = [0, 96], sizes = [8, 32], strides = [1, 1]} : vector<8x128xf32> to vector<8x32xf32>
    %293 = arith.mulf %289, %255 : vector<8x32xf32>
    %294 = arith.mulf %290, %292 : vector<8x32xf32>
    %295 = arith.addf %293, %294 : vector<8x32xf32>
    %296 = math.tanh %295 : vector<8x32xf32>
    %297 = arith.mulf %291, %296 : vector<8x32xf32>
    %c7 = arith.constant 7 : index
    %c0_43 = arith.constant 0 : index
    %c0_44 = arith.constant 0 : index
    %298 = vector.load %arg1[%c7, %c0_43, %c0_44] : memref<9x8x128xf32, #tpu.memory_space<vmem>>, vector<1x8x128xf32>
    %299 = vector.shape_cast %298 : vector<1x8x128xf32> to vector<8x128xf32>
    %cst_45 = arith.constant dense<0.000000e+00> : vector<8x128xf32>
    %300 = tpu.matmul %277, %9, %cst_45 {dimension_numbers = #tpu.dot_dimension_numbers<[1], [0], [0], [1], [0, 0, 1, 1], [], []>} : vector<8x32xf32>, vector<32x128xf32>, vector<8x128xf32> -> vector<8x128xf32>
    %301 = arith.addf %299, %300 : vector<8x128xf32>
    %302 = vector.broadcast %5 : vector<1x128xf32> to vector<8x128xf32>
    %303 = arith.mulf %301, %302 : vector<8x128xf32>
    %304 = math.tanh %303 : vector<8x128xf32>
    %305 = vector.broadcast %5 : vector<1x128xf32> to vector<8x128xf32>
    %306 = arith.mulf %304, %305 : vector<8x128xf32>
    %307 = vector.broadcast %8 : vector<1x128xf32> to vector<8x128xf32>
    %308 = arith.addf %306, %307 : vector<8x128xf32>
    %309 = vector.extract_strided_slice %308 {offsets = [0, 0], sizes = [8, 32], strides = [1, 1]} : vector<8x128xf32> to vector<8x32xf32>
    %310 = vector.extract_strided_slice %308 {offsets = [0, 32], sizes = [8, 32], strides = [1, 1]} : vector<8x128xf32> to vector<8x32xf32>
    %311 = vector.extract_strided_slice %308 {offsets = [0, 64], sizes = [8, 32], strides = [1, 1]} : vector<8x128xf32> to vector<8x32xf32>
    %312 = vector.extract_strided_slice %308 {offsets = [0, 96], sizes = [8, 32], strides = [1, 1]} : vector<8x128xf32> to vector<8x32xf32>
    %313 = arith.mulf %309, %275 : vector<8x32xf32>
    %314 = arith.mulf %310, %312 : vector<8x32xf32>
    %315 = arith.addf %313, %314 : vector<8x32xf32>
    %316 = math.tanh %315 : vector<8x32xf32>
    %317 = arith.mulf %311, %316 : vector<8x32xf32>
    %318 = tpu.concatenate %317, %297 in 1 : vector<8x32xf32>, vector<8x32xf32> -> vector<8x64xf32>
    %cst_46 = arith.constant dense<0.000000e+00> : vector<8x128xf32>
    %319 = tpu.matmul %318, %11, %cst_46 {dimension_numbers = #tpu.dot_dimension_numbers<[1], [0], [0], [1], [0, 0, 1, 1], [], []>} : vector<8x64xf32>, vector<64x128xf32>, vector<8x128xf32> -> vector<8x128xf32>
    %320 = vector.broadcast %13 : vector<1x128xf32> to vector<8x128xf32>
    %321 = arith.addf %319, %320 : vector<8x128xf32>
    %322 = vector.broadcast %5 : vector<1x128xf32> to vector<8x128xf32>
    %323 = arith.mulf %321, %322 : vector<8x128xf32>
    %324 = math.tanh %323 : vector<8x128xf32>
    %325 = vector.broadcast %5 : vector<1x128xf32> to vector<8x128xf32>
    %326 = arith.mulf %324, %325 : vector<8x128xf32>
    %327 = vector.broadcast %8 : vector<1x128xf32> to vector<8x128xf32>
    %328 = arith.addf %326, %327 : vector<8x128xf32>
    %329 = vector.extract_strided_slice %328 {offsets = [0, 0], sizes = [8, 32], strides = [1, 1]} : vector<8x128xf32> to vector<8x32xf32>
    %330 = vector.extract_strided_slice %328 {offsets = [0, 32], sizes = [8, 32], strides = [1, 1]} : vector<8x128xf32> to vector<8x32xf32>
    %331 = vector.extract_strided_slice %328 {offsets = [0, 64], sizes = [8, 32], strides = [1, 1]} : vector<8x128xf32> to vector<8x32xf32>
    %332 = vector.extract_strided_slice %328 {offsets = [0, 96], sizes = [8, 32], strides = [1, 1]} : vector<8x128xf32> to vector<8x32xf32>
    %333 = arith.mulf %329, %295 : vector<8x32xf32>
    %334 = arith.mulf %330, %332 : vector<8x32xf32>
    %335 = arith.addf %333, %334 : vector<8x32xf32>
    %336 = math.tanh %335 : vector<8x32xf32>
    %337 = arith.mulf %331, %336 : vector<8x32xf32>
    %c8 = arith.constant 8 : index
    %c0_47 = arith.constant 0 : index
    %c0_48 = arith.constant 0 : index
    %338 = vector.load %arg1[%c8, %c0_47, %c0_48] : memref<9x8x128xf32, #tpu.memory_space<vmem>>, vector<1x8x128xf32>
    %339 = vector.shape_cast %338 : vector<1x8x128xf32> to vector<8x128xf32>
    %cst_49 = arith.constant dense<0.000000e+00> : vector<8x128xf32>
    %340 = tpu.matmul %317, %9, %cst_49 {dimension_numbers = #tpu.dot_dimension_numbers<[1], [0], [0], [1], [0, 0, 1, 1], [], []>} : vector<8x32xf32>, vector<32x128xf32>, vector<8x128xf32> -> vector<8x128xf32>
    %341 = arith.addf %339, %340 : vector<8x128xf32>
    %342 = vector.broadcast %5 : vector<1x128xf32> to vector<8x128xf32>
    %343 = arith.mulf %341, %342 : vector<8x128xf32>
    %344 = math.tanh %343 : vector<8x128xf32>
    %345 = vector.broadcast %5 : vector<1x128xf32> to vector<8x128xf32>
    %346 = arith.mulf %344, %345 : vector<8x128xf32>
    %347 = vector.broadcast %8 : vector<1x128xf32> to vector<8x128xf32>
    %348 = arith.addf %346, %347 : vector<8x128xf32>
    %349 = vector.extract_strided_slice %348 {offsets = [0, 0], sizes = [8, 32], strides = [1, 1]} : vector<8x128xf32> to vector<8x32xf32>
    %350 = vector.extract_strided_slice %348 {offsets = [0, 32], sizes = [8, 32], strides = [1, 1]} : vector<8x128xf32> to vector<8x32xf32>
    %351 = vector.extract_strided_slice %348 {offsets = [0, 64], sizes = [8, 32], strides = [1, 1]} : vector<8x128xf32> to vector<8x32xf32>
    %352 = vector.extract_strided_slice %348 {offsets = [0, 96], sizes = [8, 32], strides = [1, 1]} : vector<8x128xf32> to vector<8x32xf32>
    %353 = arith.mulf %349, %315 : vector<8x32xf32>
    %354 = arith.mulf %350, %352 : vector<8x32xf32>
    %355 = arith.addf %353, %354 : vector<8x32xf32>
    %356 = math.tanh %355 : vector<8x32xf32>
    %357 = arith.mulf %351, %356 : vector<8x32xf32>
    %358 = tpu.concatenate %357, %337 in 1 : vector<8x32xf32>, vector<8x32xf32> -> vector<8x64xf32>
    %cst_50 = arith.constant dense<0.000000e+00> : vector<8x128xf32>
    %359 = tpu.matmul %358, %11, %cst_50 {dimension_numbers = #tpu.dot_dimension_numbers<[1], [0], [0], [1], [0, 0, 1, 1], [], []>} : vector<8x64xf32>, vector<64x128xf32>, vector<8x128xf32> -> vector<8x128xf32>
    %360 = vector.broadcast %13 : vector<1x128xf32> to vector<8x128xf32>
    %361 = arith.addf %359, %360 : vector<8x128xf32>
    %362 = vector.broadcast %5 : vector<1x128xf32> to vector<8x128xf32>
    %363 = arith.mulf %361, %362 : vector<8x128xf32>
    %364 = math.tanh %363 : vector<8x128xf32>
    %365 = vector.broadcast %5 : vector<1x128xf32> to vector<8x128xf32>
    %366 = arith.mulf %364, %365 : vector<8x128xf32>
    %367 = vector.broadcast %8 : vector<1x128xf32> to vector<8x128xf32>
    %368 = arith.addf %366, %367 : vector<8x128xf32>
    %369 = vector.extract_strided_slice %368 {offsets = [0, 0], sizes = [8, 32], strides = [1, 1]} : vector<8x128xf32> to vector<8x32xf32>
    %370 = vector.extract_strided_slice %368 {offsets = [0, 32], sizes = [8, 32], strides = [1, 1]} : vector<8x128xf32> to vector<8x32xf32>
    %371 = vector.extract_strided_slice %368 {offsets = [0, 64], sizes = [8, 32], strides = [1, 1]} : vector<8x128xf32> to vector<8x32xf32>
    %372 = vector.extract_strided_slice %368 {offsets = [0, 96], sizes = [8, 32], strides = [1, 1]} : vector<8x128xf32> to vector<8x32xf32>
    %373 = arith.mulf %369, %335 : vector<8x32xf32>
    %374 = arith.mulf %370, %372 : vector<8x32xf32>
    %375 = arith.addf %373, %374 : vector<8x32xf32>
    %376 = math.tanh %375 : vector<8x32xf32>
    %377 = arith.mulf %371, %376 : vector<8x32xf32>
    %c0_51 = arith.constant 0 : index
    %c0_52 = arith.constant 0 : index
    %378 = vector.load %arg5[%c0_51, %c0_52] : memref<32x128xf32, #tpu.memory_space<vmem>>, vector<32x128xf32>
    %cst_53 = arith.constant dense<0.000000e+00> : vector<8x128xf32>
    %379 = tpu.matmul %377, %378, %cst_53 {dimension_numbers = #tpu.dot_dimension_numbers<[1], [0], [0], [1], [0, 0, 1, 1], [], []>} : vector<8x32xf32>, vector<32x128xf32>, vector<8x128xf32> -> vector<8x128xf32>
    %c0_54 = arith.constant 0 : index
    %c0_55 = arith.constant 0 : index
    %380 = vector.load %arg6[%c0_54, %c0_55] : memref<1x128xf32, #tpu.memory_space<vmem>>, vector<1x128xf32>
    %381 = vector.broadcast %380 : vector<1x128xf32> to vector<8x128xf32>
    %382 = arith.addf %379, %381 : vector<8x128xf32>
    %c0_56 = arith.constant 0 : index
    %c0_57 = arith.constant 0 : index
    %383 = vector.load %arg7[%c0_56, %c0_57] : memref<8x128xf32, #tpu.memory_space<vmem>>, vector<8x128xf32>
    tpu.vector_store %arg7[%c0_56, %c0_57], %382 {strides = array<i32>} : memref<8x128xf32, #tpu.memory_space<vmem>>, vector<8x128xf32>,
    return
  }
  func.func @transform_0(%arg0: i32) -> (i32, i32, i32) {
    %c0_i32 = arith.constant 0 : i32
    %c0_i32_0 = arith.constant 0 : i32
    %c0_i32_1 = arith.constant 0 : i32
    return %c0_i32, %arg0, %c0_i32_0 : i32, i32, i32
  }
  func.func @transform_1(%arg0: i32) -> (i32, i32) {
    %c0_i32 = arith.constant 0 : i32
    %c0_i32_0 = arith.constant 0 : i32
    %c0_i32_1 = arith.constant 0 : i32
    return %c0_i32, %c0_i32_0 : i32, i32
  }
  func.func @transform_2(%arg0: i32) -> (i32, i32, i32) {
    %c0_i32 = arith.constant 0 : i32
    %c0_i32_0 = arith.constant 0 : i32
    %c0_i32_1 = arith.constant 0 : i32
    %c0_i32_2 = arith.constant 0 : i32
    return %c0_i32, %c0_i32_0, %c0_i32_1 : i32, i32, i32
  }
  func.func @transform_3(%arg0: i32) -> (i32, i32, i32) {
    %c0_i32 = arith.constant 0 : i32
    %c0_i32_0 = arith.constant 0 : i32
    %c0_i32_1 = arith.constant 0 : i32
    %c0_i32_2 = arith.constant 0 : i32
    return %c0_i32, %c0_i32_0, %c0_i32_1 : i32, i32, i32
  }
  func.func @transform_4(%arg0: i32) -> (i32, i32) {
    %c0_i32 = arith.constant 0 : i32
    %c0_i32_0 = arith.constant 0 : i32
    %c0_i32_1 = arith.constant 0 : i32
    return %c0_i32, %c0_i32_0 : i32, i32
  }
  func.func @transform_5(%arg0: i32) -> (i32, i32) {
    %c0_i32 = arith.constant 0 : i32
    %c0_i32_0 = arith.constant 0 : i32
    %c0_i32_1 = arith.constant 0 : i32
    return %c0_i32, %c0_i32_0 : i32, i32
  }
  func.func @transform_6(%arg0: i32) -> (i32, i32) {
    %c0_i32 = arith.constant 0 : i32
    %c0_i32_0 = arith.constant 0 : i32
    return %arg0, %c0_i32 : i32, i32
  }
}

</mosaic_0001>

<bundles_post_ra>
// kernel: simple_lstm_forward.1
= control target key start
LH: loop header
LB: loop body
LE: loop exit
PB: predicated region body
PF: predicated region fallthrough
CT: control target
= control target key end

     0   :  { %v2457_v0 = vmov 0.0   ;;  %vm2458_vm0 = vmmov 0   ;;  %v23_v5 = vlaneseq  ;;  %v2459_v8 = vmov 0.5   ;;  %s2460_s7 = smov 64   ;;  %s2461_s8 = smov 96   ;;  %s3117_s1 = inlined_call_operand.vmem [shape: f32[32,128], index: 1, kind: input, shape index: {}]   ;;  %s3118_s0 = inlined_call_operand.vmem [shape: f32[9,8,128], index: 0, kind: input, shape index: {}]   ;;  %s3119_s2 = inlined_call_operand.vmem [shape: f32[1,64,128], index: 2, kind: input, shape index: {}]   ;;  %s3120_s3 = inlined_call_operand.vmem [shape: f32[1,1,128], index: 3, kind: input, shape index: {}]   ;;  %s3121_s4 = inlined_call_operand.vmem [shape: f32[32,128], index: 4, kind: input, shape index: {}]   ;;  %s3122_s5 = inlined_call_operand.vmem [shape: f32[1,128], index: 5, kind: input, shape index: {}]   ;;  %s3123_s6 = inlined_call_operand.vmem [shape: f32[8,128], index: 6, kind: output, shape index: {}]  }
   0x1   :  { %2086 = vmatprep.subr.mxu0 %v2457_v0  ;;  %v2501_v1 = vld [vmem:[%s3117_s1 + $0x18] sm:$0xff]  ;;  %v2506_v2 = vld [vmem:[%s3117_s1 + $0x10] sm:$0xff]  ;;  %2094 = vmatprep.mubr.msk.f32.mxu0 %vm2458_vm0, %v2457_v0  ;;  %v2516_v3 = vld [vmem:[%s3117_s1 + $0x8] sm:$0xff]  ;;  %vm42_vm2 = vcmask 261120   ;;  %vm149_vm3 = vcmask 523264  }
   0x2   :  { %2087 = vmatpush3.msra.mxu0 %v2501_v1  ;;  %2097 = vmatprep.subr.mxu1 %v2457_v0  ;;  %v2525_v4 = vld [vmem:[%s3117_s1] sm:$0xff]  ;;  %v24_v6 = vand.u32 127, %v23_v5  ;;  %v2560_v23 = vld [vmem:[%s3119_s2 + $0x38] sm:$0xff]  ;;  %v2565_v24 = vld [vmem:[%s3119_s2 + $0x30] sm:$0xff] }
   0x3   :  { %2088 = vmatprep.subr.mxu0 %v2457_v0  ;;  %2113 = vmatprep.mubr.msk.f32.mxu1 %vm2458_vm0, %v2457_v0  ;;  %v41_v7 = vld [vmem:[%s3118_s0] sm:$0xff]  ;;  %v2572_v25 = vld [vmem:[%s3119_s2 + $0x28] sm:$0xff]  ;;  %v2586_v27 = vld [vmem:[%s3119_s2 + $0x18] sm:$0xff] }
   0x4   :  { %2089 = vmatpush3.msra.mxu0 %v2506_v2  ;;  %vm25_vm1 = vcmp.ge.s32.totalorder %v24_v6, 96  ;;  %2098 = vmatpush3.msra.mxu1 %v2560_v23  ;;  %v2579_v26 = vld [vmem:[%s3119_s2 + $0x20] sm:$0xff]  ;;  %v2593_v28 = vld [vmem:[%s3119_s2 + $0x10] sm:$0xff]  ;;  %v2601_v30 = vld [vmem:[%s3119_s2 + $0x8] sm:$0xff] }
   0x5   :  { %2090 = vmatprep.subr.mxu0 %v2457_v0  ;;  %v2545_v9 = vsel %vm25_vm1, 1.0, %v2459_v8  ;;  %v2548_v15 = vsel %vm25_vm1, 0.0, %v2459_v8  ;;  %2099 = vmatprep.subr.mxu1 %v2457_v0  ;;  %v2610_v31 = vld [vmem:[%s3119_s2] sm:$0xff]  ;;  %v1929_v36 = vld [vmem:[%s3118_s0 + $0x8] sm:$0xff] }
   0x6   :  { %2091 = vmatpush3.msra.mxu0 %v2516_v3  ;;  %2100 = vmatpush3.msra.mxu1 %v2565_v24  ;;  %v2652_v37 = vld [vmem:[%s3120_s3] ss:$0 sm:$0xff] }
   0x7   :  { %2092 = vmatprep.subr.mxu0 %v2457_v0  ;;  %2101 = vmatprep.subr.mxu1 %v2457_v0 }
   0x8   :  { %2093 = vmatpush3.msra.mxu0 %v2525_v4  ;;  %2102 = vmatpush3.msra.mxu1 %v2572_v25 }
   0x9   :  { %2095 = vmatmul.mubr.f32.vlgmr.msra.gmra.mxu0 %v2457_v0  ;;  %2116 = vmatprep.subr.mxu0 %v2457_v0 }
   0xa   :  { %2117 = vmatpush3.msra.mxu0 %v2501_v1  ;;  %2124 = vmatprep.mubr.msk.f32.mxu0 %vm2458_vm0, %v2457_v0 }
   0xb   :  { %2118 = vmatprep.subr.mxu0 %v2457_v0  ;;  %2103 = vmatprep.subr.mxu1 %v2457_v0 }
   0xc   :  { %2119 = vmatpush3.msra.mxu0 %v2506_v2  ;;  %2104 = vmatpush3.msra.mxu1 %v2579_v26 }
   0xd   :  { %2120 = vmatprep.subr.mxu0 %v2457_v0  ;;  %2105 = vmatprep.subr.mxu1 %v2457_v0 }
   0xe   :  { %2121 = vmatpush3.msra.mxu0 %v2516_v3  ;;  %2106 = vmatpush3.msra.mxu1 %v2586_v27 }
   0xf   :  { %2122 = vmatprep.subr.mxu0 %v2457_v0  ;;  %2107 = vmatprep.subr.mxu1 %v2457_v0 }
  0x10   :  { %2123 = vmatpush3.msra.mxu0 %v2525_v4  ;;  %2108 = vmatpush3.msra.mxu1 %v2593_v28 }
  0x11   :  { %2127 = vmatprep.subr.mxu0 %v2457_v0  ;;  %2109 = vmatprep.subr.mxu1 %v2457_v0 }
  0x12   :  { %2110 = vmatpush3.msra.mxu1 %v2601_v30 }
  0x13   :  { %2111 = vmatprep.subr.mxu1 %v2457_v0 }
  0x14   :  { %2112 = vmatpush3.msra.mxu1 %v2610_v31 }
  0x15   :  { %2146 = vmatprep.subr.mxu1 %v2457_v0 }
  0xc9   :  { %v112_v10 = vpop.f32.mrf.mxu0 }
  0xca   :  { %v116_v11 = vadd.f32 %v112_v10, %v41_v7 }
  0xcb   :  { %v2096_v12 = vpop.f32.mrf.mxu0 }
  0xcc   :  { %v117_v13 = vmul.f32 %v116_v11, %v2545_v9 }
  0xce   :  { %2372 = vtanh.f32 %v117_v13  ;;  %v1932_v13 = vld [vmem:[%s3118_s0 + $0x10] sm:$0xff] }
  0xdb   :  { %v2373_v14 = vpop.eup %2372 }
  0xdc   :  { %v119_v16 = vmul.f32 %v2373_v14, %v2545_v9 }
  0xde   :  { %v120_v17 = vadd.f32 %v119_v16, %v2548_v15 }
  0xe0   :  { %123 = vrot.lane.b32.xlu0 %v120_v17, %s2460_s7  ;;  %v121_v20 = vmul.f32 0.0, %v120_v17 }
 0x152   :  { %v124_v18 = vpop.permute.xlu0 %123 }
 0x153   :  { %v126_v19 = vmul.f32 %v124_v18, %v120_v17 }
 0x155   :  { %128 = vrot.lane.b32.xlu0 %v126_v19, %s2461_s8 }
 0x1c7   :  { %v129_v21 = vpop.permute.xlu0 %128 }
 0x1c8   :  { %v2554_v22 = vadd.f32 %v129_v21, %v121_v20 }
 0x1ca   :  { %2374 = vtanh.f32 %v2554_v22 }
 0x1d7   :  { %v2375_v29 = vpop.eup %2374 }
 0x1d8   :  { %134 = vrot.lane.b32.xlu1 %v2375_v29, %s2460_s7 }
 0x24a   :  { %v135_v32 = vpop.permute.xlu1 %134 }
 0x24b   :  { %v137_v33 = vmul.f32 %v135_v32, %v120_v17 }
 0x24d   :  { %139 = vrot.lane.b32.xlu1 %v137_v33, %s2460_s7 }
 0x2bf   :  { %v140_v34 = vpop.permute.xlu1 %139 }
 0x2c0   :  { %v142_v35 = vsel %vm42_vm2, %v140_v34, 0.0  ;;  %2125 = vmatmul.mubr.msk.f32.vlgmr.msra.gmra.mxu0 %vm42_vm2, %v140_v34 }
 0x2c1   :  { %2114 = vmatmul.mubr.msk.f32.vlgmr.msra.gmra.mxu1 %vm149_vm3, %v142_v35  ;;  %2128 = vmatpush3.msra.mxu0 %v2560_v23 }
 0x2c2   :  { %2129 = vmatprep.subr.mxu0 %v2457_v0  ;;  %2147 = vmatpush3.msra.mxu1 %v2501_v1 }
 0x2c3   :  { %2130 = vmatpush3.msra.mxu0 %v2565_v24  ;;  %2148 = vmatprep.subr.mxu1 %v2457_v0 }
 0x2c4   :  { %2131 = vmatprep.subr.mxu0 %v2457_v0  ;;  %2149 = vmatpush3.msra.mxu1 %v2506_v2 }
 0x2c5   :  { %2132 = vmatpush3.msra.mxu0 %v2572_v25  ;;  %2150 = vmatprep.subr.mxu1 %v2457_v0 }
 0x2c6   :  { %2133 = vmatprep.subr.mxu0 %v2457_v0  ;;  %2151 = vmatpush3.msra.mxu1 %v2516_v3 }
 0x2c7   :  { %2134 = vmatpush3.msra.mxu0 %v2579_v26  ;;  %2152 = vmatprep.subr.mxu1 %v2457_v0 }
 0x2c8   :  { %2135 = vmatprep.subr.mxu0 %v2457_v0  ;;  %2153 = vmatpush3.msra.mxu1 %v2525_v4 }
 0x2c9   :  { %2136 = vmatpush3.msra.mxu0 %v2586_v27  ;;  %2154 = vmatprep.mubr.msk.f32.mxu1 %vm2458_vm0, %v2457_v0 }
 0x2ca   :  { %2137 = vmatprep.subr.mxu0 %v2457_v0  ;;  %2143 = vmatprep.mubr.msk.f32.mxu0 %vm2458_vm0, %v2457_v0 }
 0x2cb   :  { %2138 = vmatpush3.msra.mxu0 %v2593_v28  ;;  %2157 = vmatprep.subr.mxu1 %v2457_v0 }
 0x2cc   :  { %2139 = vmatprep.subr.mxu0 %v2457_v0 }
 0x2cd   :  { %2140 = vmatpush3.msra.mxu0 %v2601_v30 }
 0x2ce   :  { %2141 = vmatprep.subr.mxu0 %v2457_v0 }
 0x2cf   :  { %2142 = vmatpush3.msra.mxu0 %v2610_v31 }
 0x2d0   :  { %2176 = vmatprep.subr.mxu0 %v2457_v0 }
 0x380   :  { %v314_v38 = vpop.f32.mrf.mxu0 }
 0x381   :  { %v318_v39 = vadd.f32 %v1929_v36, %v314_v38  ;;  %v219_v40 = vpop.f32.mrf.mxu1 }
 0x382   :  { %v220_v41 = vadd.f32 %v2652_v37, %v219_v40  ;;  %v2126_v42 = vpop.f32.mrf.mxu0 }
 0x383   :  { %v319_v43 = vmul.f32 %v318_v39, %v2545_v9  ;;  %v2115_v44 = vpop.f32.mrf.mxu1 }
 0x384   :  { %v223_v45 = vmul.f32 %v220_v41, %v2545_v9 }
 0x385   :  { %2376 = vtanh.f32 %v319_v43 }
 0x386   :  { %2378 = vtanh.f32 %v223_v45 }
 0x392   :  { %v2377_v46 = vpop.eup %2376 }
 0x393   :  { %v2379_v47 = vpop.eup %2378  ;;  %v321_v48 = vmul.f32 %v2377_v46, %v2545_v9 }
 0x394   :  { %v225_v49 = vmul.f32 %v2379_v47, %v2545_v9 }
 0x395   :  { %v322_v50 = vadd.f32 %v321_v48, %v2548_v15 }
 0x396   :  { %v226_v51 = vadd.f32 %v225_v49, %v2548_v15 }
 0x397   :  { %325 = vrot.lane.b32.xlu1 %v322_v50, %s2460_s7  ;;  %v323_v56 = vmul.f32 %v322_v50, %v2554_v22 }
 0x398   :  { %229 = vrot.lane.b32.xlu0 %v226_v51, %s2460_s7  ;;  %v227_v58 = vmul.f32 0.0, %v226_v51 }
 0x409   :  { %v326_v52 = vpop.permute.xlu1 %325 }
 0x40a   :  { %v328_v53 = vmul.f32 %v326_v52, %v322_v50  ;;  %v230_v54 = vpop.permute.xlu0 %229 }
 0x40b   :  { %v232_v55 = vmul.f32 %v230_v54, %v226_v51 }
 0x40c   :  { %330 = vrot.lane.b32.xlu1 %v328_v53, %s2461_s8 }
 0x40d   :  { %234 = vrot.lane.b32.xlu0 %v232_v55, %s2461_s8 }
 0x47e   :  { %v331_v57 = vpop.permute.xlu1 %330 }
 0x47f   :  { %v2666_v59 = vadd.f32 %v331_v57, %v323_v56  ;;  %v235_v60 = vpop.permute.xlu0 %234  ;;  %v1935_v57 = vld [vmem:[%s3118_s0 + $0x18] sm:$0xff] }
 0x480   :  { %v2668_v61 = vadd.f32 %v235_v60, %v227_v58 }
 0x481   :  { %2380 = vtanh.f32 %v2666_v59 }
 0x482   :  { %2382 = vtanh.f32 %v2668_v61 }
 0x48e   :  { %v2381_v62 = vpop.eup %2380 }
 0x48f   :  { %v2383_v63 = vpop.eup %2382  ;;  %336 = vrot.lane.b32.xlu1 %v2381_v62, %s2460_s7 }
 0x490   :  { %240 = vrot.lane.b32.xlu0 %v2383_v63, %s2460_s7 }
 0x501   :  { %v337_v5 = vpop.permute.xlu1 %336 }
 0x502   :  { %v339_v6 = vmul.f32 %v337_v5, %v322_v50  ;;  %v241_v7 = vpop.permute.xlu0 %240 }
 0x503   :  { %v243_v8 = vmul.f32 %v241_v7, %v226_v51 }
 0x504   :  { %341 = vrot.lane.b32.xlu0 %v339_v6, %s2460_s7 }
 0x505   :  { %345 = vrot.lane.b32.xlu1 %v243_v8, %s2461_s8 }
 0x576   :  { %v342_v10 = vpop.permute.xlu0 %341 }
 0x577   :  { %v346_v11 = vpop.permute.xlu1 %345  ;;  %2155 = vmatmul.mubr.msk.f32.vlgmr.msra.gmra.mxu1 %vm42_vm2, %v342_v10 }
 0x578   :  { %v348_v12 = vsel %vm42_vm2, %v342_v10, %v346_v11  ;;  %2158 = vmatpush3.msra.mxu1 %v2560_v23  ;;  %2173 = vmatprep.mubr.msk.f32.mxu1 %vm2458_vm0, %v2457_v0 }
 0x579   :  { %2144 = vmatmul.mubr.msk.f32.vlgmr.msra.gmra.mxu0 %vm149_vm3, %v348_v12  ;;  %2159 = vmatprep.subr.mxu1 %v2457_v0 }
 0x57a   :  { %2160 = vmatpush3.msra.mxu1 %v2565_v24  ;;  %2177 = vmatpush3.msra.mxu0 %v2501_v1 }
 0x57b   :  { %2161 = vmatprep.subr.mxu1 %v2457_v0  ;;  %2178 = vmatprep.subr.mxu0 %v2457_v0 }
 0x57c   :  { %2162 = vmatpush3.msra.mxu1 %v2572_v25  ;;  %2179 = vmatpush3.msra.mxu0 %v2506_v2 }
 0x57d   :  { %2163 = vmatprep.subr.mxu1 %v2457_v0  ;;  %2180 = vmatprep.subr.mxu0 %v2457_v0 }
 0x57e   :  { %2164 = vmatpush3.msra.mxu1 %v2579_v26  ;;  %2181 = vmatpush3.msra.mxu0 %v2516_v3 }
 0x57f   :  { %2165 = vmatprep.subr.mxu1 %v2457_v0  ;;  %2182 = vmatprep.subr.mxu0 %v2457_v0 }
 0x580   :  { %2166 = vmatpush3.msra.mxu1 %v2586_v27  ;;  %2183 = vmatpush3.msra.mxu0 %v2525_v4 }
 0x581   :  { %2167 = vmatprep.subr.mxu1 %v2457_v0  ;;  %2184 = vmatprep.mubr.msk.f32.mxu0 %vm2458_vm0, %v2457_v0 }
 0x582   :  { %2168 = vmatpush3.msra.mxu1 %v2593_v28  ;;  %2187 = vmatprep.subr.mxu0 %v2457_v0 }
 0x583   :  { %2169 = vmatprep.subr.mxu1 %v2457_v0 }
 0x584   :  { %2170 = vmatpush3.msra.mxu1 %v2601_v30 }
 0x585   :  { %2171 = vmatprep.subr.mxu1 %v2457_v0 }
 0x586   :  { %2172 = vmatpush3.msra.mxu1 %v2610_v31 }
 0x587   :  { %2206 = vmatprep.subr.mxu1 %v2457_v0 }
 0x637   :  { %v513_v14 = vpop.f32.mrf.mxu1 }
 0x638   :  { %v517_v16 = vadd.f32 %v1932_v13, %v513_v14 }
 0x639   :  { %v418_v17 = vpop.f32.mrf.mxu0  ;;  %v2156_v18 = vpop.f32.mrf.mxu1 }
 0x63a   :  { %v518_v19 = vmul.f32 %v517_v16, %v2545_v9  ;;  %v419_v20 = vadd.f32 %v2652_v37, %v418_v17 }
 0x63b   :  { %v2145_v21 = vpop.f32.mrf.mxu0 }
 0x63c   :  { %2384 = vtanh.f32 %v518_v19  ;;  %v422_v22 = vmul.f32 %v419_v20, %v2545_v9 }
 0x63e   :  { %2386 = vtanh.f32 %v422_v22 }
 0x649   :  { %v2385_v29 = vpop.eup %2384 }
 0x64a   :  { %v520_v32 = vmul.f32 %v2385_v29, %v2545_v9 }
 0x64b   :  { %v2387_v33 = vpop.eup %2386 }
 0x64c   :  { %v521_v34 = vadd.f32 %v520_v32, %v2548_v15  ;;  %v424_v35 = vmul.f32 %v2387_v33, %v2545_v9 }
 0x64e   :  { %524 = vrot.lane.b32.xlu1 %v521_v34, %s2460_s7  ;;  %v425_v36 = vadd.f32 %v424_v35, %v2548_v15  ;;  %v522_v42 = vmul.f32 %v521_v34, %v2666_v59 }
 0x650   :  { %428 = vrot.lane.b32.xlu0 %v425_v36, %s2460_s7  ;;  %v426_v45 = vmul.f32 %v425_v36, %v2668_v61 }
 0x6c0   :  { %v525_v38 = vpop.permute.xlu1 %524 }
 0x6c1   :  { %v527_v39 = vmul.f32 %v525_v38, %v521_v34 }
 0x6c2   :  { %v429_v40 = vpop.permute.xlu0 %428 }
 0x6c3   :  { %v431_v41 = vmul.f32 %v429_v40, %v425_v36  ;;  %529 = vrot.lane.b32.xlu1 %v527_v39, %s2461_s8 }
 0x6c5   :  { %433 = vrot.lane.b32.xlu0 %v431_v41, %s2461_s8 }
 0x735   :  { %v530_v43 = vpop.permute.xlu1 %529 }
 0x736   :  { %v2722_v44 = vadd.f32 %v530_v43, %v522_v42  ;;  %v1938_v43 = vld [vmem:[%s3118_s0 + $0x20] sm:$0xff] }
 0x737   :  { %v434_v46 = vpop.permute.xlu0 %433 }
 0x738   :  { %2388 = vtanh.f32 %v2722_v44  ;;  %v2726_v47 = vadd.f32 %v434_v46, %v426_v45 }
 0x73a   :  { %2390 = vtanh.f32 %v2726_v47 }
 0x745   :  { %v2389_v48 = vpop.eup %2388 }
 0x746   :  { %535 = vrot.lane.b32.xlu1 %v2389_v48, %s2460_s7 }
 0x747   :  { %v2391_v49 = vpop.eup %2390 }
 0x748   :  { %439 = vrot.lane.b32.xlu0 %v2391_v49, %s2460_s7 }
 0x7b8   :  { %v536_v50 = vpop.permute.xlu1 %535 }
 0x7b9   :  { %v538_v51 = vmul.f32 %v536_v50, %v521_v34 }
 0x7ba   :  { %v440_v52 = vpop.permute.xlu0 %439 }
 0x7bb   :  { %v442_v53 = vmul.f32 %v440_v52, %v425_v36  ;;  %540 = vrot.lane.b32.xlu0 %v538_v51, %s2460_s7 }
 0x7bd   :  { %544 = vrot.lane.b32.xlu1 %v442_v53, %s2461_s8 }
 0x82d   :  { %v541_v54 = vpop.permute.xlu0 %540 }
 0x82e   :  { %2185 = vmatmul.mubr.msk.f32.vlgmr.msra.gmra.mxu0 %vm42_vm2, %v541_v54 }
 0x82f   :  { %v545_v55 = vpop.permute.xlu1 %544  ;;  %2188 = vmatpush3.msra.mxu0 %v2560_v23  ;;  %2203 = vmatprep.mubr.msk.f32.mxu0 %vm2458_vm0, %v2457_v0 }
 0x830   :  { %v547_v56 = vsel %vm42_vm2, %v541_v54, %v545_v55  ;;  %2189 = vmatprep.subr.mxu0 %v2457_v0 }
 0x831   :  { %2174 = vmatmul.mubr.msk.f32.vlgmr.msra.gmra.mxu1 %vm149_vm3, %v547_v56  ;;  %2190 = vmatpush3.msra.mxu0 %v2565_v24 }
 0x832   :  { %2191 = vmatprep.subr.mxu0 %v2457_v0  ;;  %2207 = vmatpush3.msra.mxu1 %v2501_v1 }
 0x833   :  { %2192 = vmatpush3.msra.mxu0 %v2572_v25  ;;  %2208 = vmatprep.subr.mxu1 %v2457_v0 }
 0x834   :  { %2193 = vmatprep.subr.mxu0 %v2457_v0  ;;  %2209 = vmatpush3.msra.mxu1 %v2506_v2 }
 0x835   :  { %2194 = vmatpush3.msra.mxu0 %v2579_v26  ;;  %2210 = vmatprep.subr.mxu1 %v2457_v0 }
 0x836   :  { %2195 = vmatprep.subr.mxu0 %v2457_v0  ;;  %2211 = vmatpush3.msra.mxu1 %v2516_v3 }
 0x837   :  { %2196 = vmatpush3.msra.mxu0 %v2586_v27  ;;  %2212 = vmatprep.subr.mxu1 %v2457_v0 }
 0x838   :  { %2197 = vmatprep.subr.mxu0 %v2457_v0  ;;  %2213 = vmatpush3.msra.mxu1 %v2525_v4 }
 0x839   :  { %2198 = vmatpush3.msra.mxu0 %v2593_v28  ;;  %2214 = vmatprep.mubr.msk.f32.mxu1 %vm2458_vm0, %v2457_v0 }
 0x83a   :  { %2199 = vmatprep.subr.mxu0 %v2457_v0  ;;  %2217 = vmatprep.subr.mxu1 %v2457_v0 }
 0x83b   :  { %2200 = vmatpush3.msra.mxu0 %v2601_v30 }
 0x83c   :  { %2201 = vmatprep.subr.mxu0 %v2457_v0 }
 0x83d   :  { %2202 = vmatpush3.msra.mxu0 %v2610_v31 }
 0x83e   :  { %2236 = vmatprep.subr.mxu0 %v2457_v0 }
 0x8ee   :  { %v712_v58 = vpop.f32.mrf.mxu0 }
 0x8ef   :  { %v716_v59 = vadd.f32 %v1935_v57, %v712_v58 }
 0x8f0   :  { %v2186_v60 = vpop.f32.mrf.mxu0 }
 0x8f1   :  { %v717_v61 = vmul.f32 %v716_v59, %v2545_v9  ;;  %v617_v62 = vpop.f32.mrf.mxu1 }
 0x8f2   :  { %v618_v63 = vadd.f32 %v2652_v37, %v617_v62 }
 0x8f3   :  { %2392 = vtanh.f32 %v717_v61  ;;  %v2175_v5 = vpop.f32.mrf.mxu1 }
 0x8f4   :  { %v621_v6 = vmul.f32 %v618_v63, %v2545_v9 }
 0x8f6   :  { %2394 = vtanh.f32 %v621_v6 }
 0x900   :  { %v2393_v7 = vpop.eup %2392 }
 0x901   :  { %v719_v8 = vmul.f32 %v2393_v7, %v2545_v9 }
 0x903   :  { %v2395_v10 = vpop.eup %2394  ;;  %v720_v11 = vadd.f32 %v719_v8, %v2548_v15 }
 0x904   :  { %v623_v12 = vmul.f32 %v2395_v10, %v2545_v9 }
 0x905   :  { %723 = vrot.lane.b32.xlu1 %v720_v11, %s2460_s7  ;;  %v721_v19 = vmul.f32 %v720_v11, %v2722_v44 }
 0x906   :  { %v624_v13 = vadd.f32 %v623_v12, %v2548_v15 }
 0x908   :  { %627 = vrot.lane.b32.xlu0 %v624_v13, %s2460_s7  ;;  %v625_v22 = vmul.f32 %v624_v13, %v2726_v47 }
 0x977   :  { %v724_v14 = vpop.permute.xlu1 %723 }
 0x978   :  { %v726_v16 = vmul.f32 %v724_v14, %v720_v11 }
 0x97a   :  { %728 = vrot.lane.b32.xlu1 %v726_v16, %s2461_s8  ;;  %v628_v17 = vpop.permute.xlu0 %627 }
 0x97b   :  { %v630_v18 = vmul.f32 %v628_v17, %v624_v13 }
 0x97d   :  { %632 = vrot.lane.b32.xlu0 %v630_v18, %s2461_s8 }
 0x9ec   :  { %v729_v20 = vpop.permute.xlu1 %728 }
 0x9ed   :  { %v2779_v21 = vadd.f32 %v729_v20, %v721_v19  ;;  %v1941_v20 = vld [vmem:[%s3118_s0 + $0x28] sm:$0xff] }
 0x9ef   :  { %2396 = vtanh.f32 %v2779_v21  ;;  %v633_v29 = vpop.permute.xlu0 %632 }
 0x9f0   :  { %v2783_v32 = vadd.f32 %v633_v29, %v625_v22 }
 0x9f2   :  { %2398 = vtanh.f32 %v2783_v32 }
 0x9fc   :  { %v2397_v33 = vpop.eup %2396 }
 0x9fd   :  { %734 = vrot.lane.b32.xlu1 %v2397_v33, %s2460_s7 }
 0x9ff   :  { %v2399_v34 = vpop.eup %2398 }
 0xa00   :  { %638 = vrot.lane.b32.xlu0 %v2399_v34, %s2460_s7 }
 0xa6f   :  { %v735_v35 = vpop.permute.xlu1 %734 }
 0xa70   :  { %v737_v36 = vmul.f32 %v735_v35, %v720_v11 }
 0xa72   :  { %739 = vrot.lane.b32.xlu0 %v737_v36, %s2460_s7  ;;  %v639_v38 = vpop.permute.xlu0 %638 }
 0xa73   :  { %v641_v39 = vmul.f32 %v639_v38, %v624_v13 }
 0xa75   :  { %743 = vrot.lane.b32.xlu1 %v641_v39, %s2461_s8 }
 0xae4   :  { %v740_v40 = vpop.permute.xlu0 %739 }
 0xae5   :  { %2215 = vmatmul.mubr.msk.f32.vlgmr.msra.gmra.mxu1 %vm42_vm2, %v740_v40 }
 0xae6   :  { %2218 = vmatpush3.msra.mxu1 %v2560_v23  ;;  %2233 = vmatprep.mubr.msk.f32.mxu1 %vm2458_vm0, %v2457_v0 }
 0xae7   :  { %v744_v41 = vpop.permute.xlu1 %743  ;;  %2219 = vmatprep.subr.mxu1 %v2457_v0 }
 0xae8   :  { %v746_v42 = vsel %vm42_vm2, %v740_v40, %v744_v41  ;;  %2220 = vmatpush3.msra.mxu1 %v2565_v24 }
 0xae9   :  { %2204 = vmatmul.mubr.msk.f32.vlgmr.msra.gmra.mxu0 %vm149_vm3, %v746_v42  ;;  %2221 = vmatprep.subr.mxu1 %v2457_v0 }
 0xaea   :  { %2237 = vmatpush3.msra.mxu0 %v2501_v1  ;;  %2222 = vmatpush3.msra.mxu1 %v2572_v25 }
 0xaeb   :  { %2238 = vmatprep.subr.mxu0 %v2457_v0  ;;  %2223 = vmatprep.subr.mxu1 %v2457_v0 }
 0xaec   :  { %2239 = vmatpush3.msra.mxu0 %v2506_v2  ;;  %2224 = vmatpush3.msra.mxu1 %v2579_v26 }
 0xaed   :  { %2240 = vmatprep.subr.mxu0 %v2457_v0  ;;  %2225 = vmatprep.subr.mxu1 %v2457_v0 }
 0xaee   :  { %2241 = vmatpush3.msra.mxu0 %v2516_v3  ;;  %2226 = vmatpush3.msra.mxu1 %v2586_v27 }
 0xaef   :  { %2242 = vmatprep.subr.mxu0 %v2457_v0  ;;  %2227 = vmatprep.subr.mxu1 %v2457_v0 }
 0xaf0   :  { %2243 = vmatpush3.msra.mxu0 %v2525_v4  ;;  %2244 = vmatprep.mubr.msk.f32.mxu0 %vm2458_vm0, %v2457_v0 }
 0xaf1   :  { %2228 = vmatpush3.msra.mxu1 %v2593_v28  ;;  %2247 = vmatprep.subr.mxu0 %v2457_v0 }
 0xaf2   :  { %2229 = vmatprep.subr.mxu1 %v2457_v0 }
 0xaf3   :  { %2230 = vmatpush3.msra.mxu1 %v2601_v30 }
 0xaf4   :  { %2231 = vmatprep.subr.mxu1 %v2457_v0 }
 0xaf5   :  { %2232 = vmatpush3.msra.mxu1 %v2610_v31 }
 0xaf6   :  { %2266 = vmatprep.subr.mxu1 %v2457_v0 }
 0xba5   :  { %v911_v44 = vpop.f32.mrf.mxu1 }
 0xba6   :  { %v915_v45 = vadd.f32 %v1938_v43, %v911_v44 }
 0xba7   :  { %v2216_v46 = vpop.f32.mrf.mxu1 }
 0xba8   :  { %v916_v47 = vmul.f32 %v915_v45, %v2545_v9 }
 0xba9   :  { %v816_v48 = vpop.f32.mrf.mxu0 }
 0xbaa   :  { %2400 = vtanh.f32 %v916_v47  ;;  %v817_v49 = vadd.f32 %v2652_v37, %v816_v48 }
 0xbab   :  { %v2205_v50 = vpop.f32.mrf.mxu0 }
 0xbac   :  { %v820_v51 = vmul.f32 %v817_v49, %v2545_v9 }
 0xbae   :  { %2402 = vtanh.f32 %v820_v51 }
 0xbb7   :  { %v2401_v52 = vpop.eup %2400 }
 0xbb8   :  { %v918_v53 = vmul.f32 %v2401_v52, %v2545_v9 }
 0xbba   :  { %v919_v54 = vadd.f32 %v918_v53, %v2548_v15 }
 0xbbb   :  { %v2403_v55 = vpop.eup %2402 }
 0xbbc   :  { %922 = vrot.lane.b32.xlu1 %v919_v54, %s2460_s7  ;;  %v822_v56 = vmul.f32 %v2403_v55, %v2545_v9  ;;  %v920_v62 = vmul.f32 %v919_v54, %v2779_v21 }
 0xbbe   :  { %v823_v57 = vadd.f32 %v822_v56, %v2548_v15 }
 0xbc0   :  { %826 = vrot.lane.b32.xlu0 %v823_v57, %s2460_s7  ;;  %v824_v6 = vmul.f32 %v823_v57, %v2783_v32 }
 0xc2e   :  { %v923_v58 = vpop.permute.xlu1 %922 }
 0xc2f   :  { %v925_v59 = vmul.f32 %v923_v58, %v919_v54 }
 0xc31   :  { %927 = vrot.lane.b32.xlu1 %v925_v59, %s2461_s8 }
 0xc32   :  { %v827_v60 = vpop.permute.xlu0 %826 }
 0xc33   :  { %v829_v61 = vmul.f32 %v827_v60, %v823_v57 }
 0xc35   :  { %831 = vrot.lane.b32.xlu0 %v829_v61, %s2461_s8 }
 0xca3   :  { %v928_v63 = vpop.permute.xlu1 %927 }
 0xca4   :  { %v2836_v5 = vadd.f32 %v928_v63, %v920_v62 }
 0xca6   :  { %2404 = vtanh.f32 %v2836_v5 }
 0xca7   :  { %v832_v7 = vpop.permute.xlu0 %831 }
 0xca8   :  { %v2840_v8 = vadd.f32 %v832_v7, %v824_v6 }
 0xcaa   :  { %2406 = vtanh.f32 %v2840_v8 }
 0xcb3   :  { %v2405_v10 = vpop.eup %2404 }
 0xcb4   :  { %933 = vrot.lane.b32.xlu1 %v2405_v10, %s2460_s7 }
 0xcb7   :  { %v2407_v11 = vpop.eup %2406 }
 0xcb8   :  { %837 = vrot.lane.b32.xlu0 %v2407_v11, %s2460_s7 }
 0xd26   :  { %v934_v12 = vpop.permute.xlu1 %933 }
 0xd27   :  { %v936_v13 = vmul.f32 %v934_v12, %v919_v54 }
 0xd29   :  { %938 = vrot.lane.b32.xlu0 %v936_v13, %s2460_s7 }
 0xd2a   :  { %v838_v14 = vpop.permute.xlu0 %837 }
 0xd2b   :  { %v840_v16 = vmul.f32 %v838_v14, %v823_v57 }
 0xd2d   :  { %942 = vrot.lane.b32.xlu1 %v840_v16, %s2461_s8 }
 0xd9b   :  { %v939_v17 = vpop.permute.xlu0 %938 }
 0xd9c   :  { %2245 = vmatmul.mubr.msk.f32.vlgmr.msra.gmra.mxu0 %vm42_vm2, %v939_v17 }
 0xd9d   :  { %2248 = vmatpush3.msra.mxu0 %v2560_v23  ;;  %2263 = vmatprep.mubr.msk.f32.mxu0 %vm2458_vm0, %v2457_v0 }
 0xd9e   :  { %2249 = vmatprep.subr.mxu0 %v2457_v0 }
 0xd9f   :  { %v943_v18 = vpop.permute.xlu1 %942  ;;  %2250 = vmatpush3.msra.mxu0 %v2565_v24 }
 0xda0   :  { %v945_v19 = vsel %vm42_vm2, %v939_v17, %v943_v18  ;;  %2251 = vmatprep.subr.mxu0 %v2457_v0 }
 0xda1   :  { %2234 = vmatmul.mubr.msk.f32.vlgmr.msra.gmra.mxu1 %vm149_vm3, %v945_v19  ;;  %2252 = vmatpush3.msra.mxu0 %v2572_v25 }
 0xda2   :  { %2267 = vmatpush3.msra.mxu1 %v2501_v1  ;;  %2253 = vmatprep.subr.mxu0 %v2457_v0 }
 0xda3   :  { %2268 = vmatprep.subr.mxu1 %v2457_v0  ;;  %2254 = vmatpush3.msra.mxu0 %v2579_v26 }
 0xda4   :  { %2269 = vmatpush3.msra.mxu1 %v2506_v2  ;;  %2255 = vmatprep.subr.mxu0 %v2457_v0 }
 0xda5   :  { %2270 = vmatprep.subr.mxu1 %v2457_v0  ;;  %2256 = vmatpush3.msra.mxu0 %v2586_v27 }
 0xda6   :  { %2271 = vmatpush3.msra.mxu1 %v2516_v3  ;;  %2274 = vmatprep.mubr.msk.f32.mxu1 %vm2458_vm0, %v2457_v0 }
 0xda7   :  { %2272 = vmatprep.subr.mxu1 %v2457_v0  ;;  %2257 = vmatprep.subr.mxu0 %v2457_v0 }
 0xda8   :  { %2273 = vmatpush3.msra.mxu1 %v2525_v4  ;;  %2258 = vmatpush3.msra.mxu0 %v2593_v28 }
 0xda9   :  { %2259 = vmatprep.subr.mxu0 %v2457_v0  ;;  %2277 = vmatprep.subr.mxu1 %v2457_v0 }
 0xdaa   :  { %2260 = vmatpush3.msra.mxu0 %v2601_v30 }
 0xdab   :  { %2261 = vmatprep.subr.mxu0 %v2457_v0 }
 0xdac   :  { %2262 = vmatpush3.msra.mxu0 %v2610_v31 }
 0xdad   :  { %2296 = vmatprep.subr.mxu0 %v2457_v0 }
 0xe5c   :  { %v1110_v21 = vpop.f32.mrf.mxu0 }
 0xe5d   :  { %v1114_v22 = vadd.f32 %v1941_v20, %v1110_v21 }
 0xe5e   :  { %v2246_v29 = vpop.f32.mrf.mxu0 }
 0xe5f   :  { %v1115_v32 = vmul.f32 %v1114_v22, %v2545_v9 }
 0xe61   :  { %2408 = vtanh.f32 %v1115_v32  ;;  %v1015_v33 = vpop.f32.mrf.mxu1 }
 0xe62   :  { %v1016_v34 = vadd.f32 %v2652_v37, %v1015_v33 }
 0xe63   :  { %v2235_v35 = vpop.f32.mrf.mxu1 }
 0xe64   :  { %v1019_v36 = vmul.f32 %v1016_v34, %v2545_v9 }
 0xe66   :  { %2410 = vtanh.f32 %v1019_v36 }
 0xe6e   :  { %v2409_v38 = vpop.eup %2408 }
 0xe6f   :  { %v1117_v39 = vmul.f32 %v2409_v38, %v2545_v9 }
 0xe71   :  { %v1118_v40 = vadd.f32 %v1117_v39, %v2548_v15 }
 0xe73   :  { %v2411_v41 = vpop.eup %2410  ;;  %1121 = vrot.lane.b32.xlu1 %v1118_v40, %s2460_s7  ;;  %v1119_v48 = vmul.f32 %v1118_v40, %v2836_v5 }
 0xe74   :  { %v1021_v42 = vmul.f32 %v2411_v41, %v2545_v9 }
 0xe76   :  { %v1022_v43 = vadd.f32 %v1021_v42, %v2548_v15 }
 0xe78   :  { %1025 = vrot.lane.b32.xlu0 %v1022_v43, %s2460_s7  ;;  %v1023_v51 = vmul.f32 %v1022_v43, %v2840_v8 }
 0xee5   :  { %v1122_v44 = vpop.permute.xlu1 %1121 }
 0xee6   :  { %v1124_v45 = vmul.f32 %v1122_v44, %v1118_v40 }
 0xee8   :  { %1126 = vrot.lane.b32.xlu1 %v1124_v45, %s2461_s8 }
 0xeea   :  { %v1026_v46 = vpop.permute.xlu0 %1025 }
 0xeeb   :  { %v1028_v47 = vmul.f32 %v1026_v46, %v1022_v43 }
 0xeed   :  { %1030 = vrot.lane.b32.xlu0 %v1028_v47, %s2461_s8 }
 0xf5a   :  { %v1127_v49 = vpop.permute.xlu1 %1126 }
 0xf5b   :  { %v2893_v50 = vadd.f32 %v1127_v49, %v1119_v48 }
 0xf5d   :  { %2412 = vtanh.f32 %v2893_v50 }
 0xf5f   :  { %v1031_v52 = vpop.permute.xlu0 %1030 }
 0xf60   :  { %v2897_v53 = vadd.f32 %v1031_v52, %v1023_v51 }
 0xf62   :  { %2414 = vtanh.f32 %v2897_v53 }
 0xf6a   :  { %v2413_v54 = vpop.eup %2412 }
 0xf6b   :  { %1132 = vrot.lane.b32.xlu1 %v2413_v54, %s2460_s7 }
 0xf6f   :  { %v2415_v55 = vpop.eup %2414 }
 0xf70   :  { %1036 = vrot.lane.b32.xlu0 %v2415_v55, %s2460_s7 }
 0xfdd   :  { %v1133_v56 = vpop.permute.xlu1 %1132 }
 0xfde   :  { %v1135_v57 = vmul.f32 %v1133_v56, %v1118_v40 }
 0xfe0   :  { %1137 = vrot.lane.b32.xlu0 %v1135_v57, %s2460_s7 }
 0xfe2   :  { %v1037_v58 = vpop.permute.xlu0 %1036 }
 0xfe3   :  { %v1039_v59 = vmul.f32 %v1037_v58, %v1022_v43 }
 0xfe5   :  { %1141 = vrot.lane.b32.xlu1 %v1039_v59, %s2461_s8 }
0x1052   :  { %v1138_v60 = vpop.permute.xlu0 %1137 }
0x1053   :  { %2275 = vmatmul.mubr.msk.f32.vlgmr.msra.gmra.mxu1 %vm42_vm2, %v1138_v60 }
0x1054   :  { %2278 = vmatpush3.msra.mxu1 %v2560_v23  ;;  %2293 = vmatprep.mubr.msk.f32.mxu1 %vm2458_vm0, %v2457_v0 }
0x1055   :  { %2279 = vmatprep.subr.mxu1 %v2457_v0 }
0x1056   :  { %2280 = vmatpush3.msra.mxu1 %v2565_v24 }
0x1057   :  { %v1142_v61 = vpop.permute.xlu1 %1141  ;;  %2281 = vmatprep.subr.mxu1 %v2457_v0 }
0x1058   :  { %v1144_v62 = vsel %vm42_vm2, %v1138_v60, %v1142_v61  ;;  %2282 = vmatpush3.msra.mxu1 %v2572_v25 }
0x1059   :  { %2264 = vmatmul.mubr.msk.f32.vlgmr.msra.gmra.mxu0 %vm149_vm3, %v1144_v62  ;;  %2283 = vmatprep.subr.mxu1 %v2457_v0 }
0x105a   :  { %2297 = vmatpush3.msra.mxu0 %v2501_v1  ;;  %2284 = vmatpush3.msra.mxu1 %v2579_v26  ;;  %v1944_v1 = vld [vmem:[%s3118_s0 + $0x30] sm:$0xff] }
0x105b   :  { %2298 = vmatprep.subr.mxu0 %v2457_v0  ;;  %2285 = vmatprep.subr.mxu1 %v2457_v0 }
0x105c   :  { %2299 = vmatpush3.msra.mxu0 %v2506_v2  ;;  %2304 = vmatprep.mubr.msk.f32.mxu0 %vm2458_vm0, %v2457_v0 }
0x105d   :  { %2300 = vmatprep.subr.mxu0 %v2457_v0  ;;  %2286 = vmatpush3.msra.mxu1 %v2586_v27 }
0x105e   :  { %2301 = vmatpush3.msra.mxu0 %v2516_v3  ;;  %2287 = vmatprep.subr.mxu1 %v2457_v0 }
0x105f   :  { %2302 = vmatprep.subr.mxu0 %v2457_v0  ;;  %2288 = vmatpush3.msra.mxu1 %v2593_v28 }
0x1060   :  { %2303 = vmatpush3.msra.mxu0 %v2525_v4  ;;  %2289 = vmatprep.subr.mxu1 %v2457_v0 }
0x1061   :  { %2290 = vmatpush3.msra.mxu1 %v2601_v30  ;;  %2307 = vmatprep.subr.mxu0 %v2457_v0 }
0x1062   :  { %2291 = vmatprep.subr.mxu1 %v2457_v0 }
0x1063   :  { %2292 = vmatpush3.msra.mxu1 %v2610_v31 }
0x1064   :  { %2326 = vmatprep.subr.mxu1 %v2457_v0 }
0x1113   :  { %v1309_v2 = vpop.f32.mrf.mxu1 }
0x1114   :  { %v1313_v3 = vadd.f32 %v1944_v1, %v1309_v2 }
0x1115   :  { %v2276_v63 = vpop.f32.mrf.mxu1 }
0x1116   :  { %v1314_v4 = vmul.f32 %v1313_v3, %v2545_v9 }
0x1118   :  { %2416 = vtanh.f32 %v1314_v4 }
0x1119   :  { %v1214_v5 = vpop.f32.mrf.mxu0 }
0x111a   :  { %v1215_v6 = vadd.f32 %v2652_v37, %v1214_v5 }
0x111b   :  { %v2265_v7 = vpop.f32.mrf.mxu0 }
0x111c   :  { %v1218_v8 = vmul.f32 %v1215_v6, %v2545_v9 }
0x111e   :  { %2418 = vtanh.f32 %v1218_v8 }
0x1125   :  { %v2417_v10 = vpop.eup %2416 }
0x1126   :  { %v1316_v11 = vmul.f32 %v2417_v10, %v2545_v9  ;;  %v2448_v10 = vld [vmem:[%s3119_s2 + $0x38] sm:$0xff] }
0x1128   :  { %v1317_v12 = vadd.f32 %v1316_v11, %v2548_v15  ;;  %v2449_v11 = vld [vmem:[%s3119_s2 + $0x30] sm:$0xff] }
0x112a   :  { %1320 = vrot.lane.b32.xlu1 %v1317_v12, %s2460_s7  ;;  %v1318_v21 = vmul.f32 %v1317_v12, %v2893_v50 }
0x112b   :  { %v2419_v13 = vpop.eup %2418 }
0x112c   :  { %v1220_v14 = vmul.f32 %v2419_v13, %v2545_v9 }
0x112e   :  { %v1221_v16 = vadd.f32 %v1220_v14, %v2548_v15 }
0x1130   :  { %1224 = vrot.lane.b32.xlu0 %v1221_v16, %s2460_s7  ;;  %v1222_v32 = vmul.f32 %v1221_v16, %v2897_v53 }
0x119c   :  { %v1321_v17 = vpop.permute.xlu1 %1320 }
0x119d   :  { %v1323_v18 = vmul.f32 %v1321_v17, %v1317_v12  ;;  %v2452_v17 = vld [vmem:[%s3119_s2 + $0x18] sm:$0xff] }
0x119f   :  { %1325 = vrot.lane.b32.xlu1 %v1323_v18, %s2461_s8  ;;  %v2453_v18 = vld [vmem:[%s3119_s2 + $0x10] sm:$0xff] }
0x11a2   :  { %v1225_v19 = vpop.permute.xlu0 %1224 }
0x11a3   :  { %v1227_v20 = vmul.f32 %v1225_v19, %v1221_v16  ;;  %v2454_v19 = vld [vmem:[%s3119_s2 + $0x8] sm:$0xff] }
0x11a5   :  { %1229 = vrot.lane.b32.xlu0 %v1227_v20, %s2461_s8  ;;  %v2455_v20 = vld [vmem:[%s3119_s2] sm:$0xff] }
0x1211   :  { %v1326_v22 = vpop.permute.xlu1 %1325 }
0x1212   :  { %v2950_v29 = vadd.f32 %v1326_v22, %v1318_v21  ;;  %v1950_v21 = vld [vmem:[%s3118_s0 + $0x40] sm:$0xff] }
0x1214   :  { %2420 = vtanh.f32 %v2950_v29 }
0x1217   :  { %v1230_v33 = vpop.permute.xlu0 %1229 }
0x1218   :  { %v2954_v34 = vadd.f32 %v1230_v33, %v1222_v32 }
0x121a   :  { %2422 = vtanh.f32 %v2954_v34 }
0x1221   :  { %v2421_v35 = vpop.eup %2420 }
0x1222   :  { %1331 = vrot.lane.b32.xlu1 %v2421_v35, %s2460_s7  ;;  %v2456_v35 = vld [vmem:[%s3120_s3] ss:$0 sm:$0xff] }
0x1227   :  { %v2423_v36 = vpop.eup %2422 }
0x1228   :  { %1235 = vrot.lane.b32.xlu0 %v2423_v36, %s2460_s7 }
0x1294   :  { %v1332_v38 = vpop.permute.xlu1 %1331 }
0x1295   :  { %v1334_v39 = vmul.f32 %v1332_v38, %v1317_v12  ;;  %v2450_v12 = vld [vmem:[%s3119_s2 + $0x28] sm:$0xff] }
0x1297   :  { %1336 = vrot.lane.b32.xlu0 %v1334_v39, %s2460_s7 }
0x129a   :  { %v1236_v40 = vpop.permute.xlu0 %1235 }
0x129b   :  { %v1238_v41 = vmul.f32 %v1236_v40, %v1221_v16  ;;  %v2451_v16 = vld [vmem:[%s3119_s2 + $0x20] sm:$0xff] }
0x129d   :  { %1340 = vrot.lane.b32.xlu1 %v1238_v41, %s2461_s8 }
0x1309   :  { %v1337_v42 = vpop.permute.xlu0 %1336 }
0x130a   :  { %2305 = vmatmul.mubr.msk.f32.vlgmr.msra.gmra.mxu0 %vm42_vm2, %v1337_v42 }
0x130b   :  { %2308 = vmatpush3.msra.mxu0 %v2560_v23  ;;  %2323 = vmatprep.mubr.msk.f32.mxu0 %vm2458_vm0, %v2457_v0  ;;  %v2444_v23 = vld [vmem:[%s3117_s1 + $0x18] sm:$0xff] }
0x130c   :  { %2309 = vmatprep.subr.mxu0 %v2457_v0 }
0x130d   :  { %2310 = vmatpush3.msra.mxu0 %v2565_v24  ;;  %v2445_v24 = vld [vmem:[%s3117_s1 + $0x10] sm:$0xff] }
0x130e   :  { %2311 = vmatprep.subr.mxu0 %v2457_v0 }
0x130f   :  { %v1341_v43 = vpop.permute.xlu1 %1340  ;;  %2312 = vmatpush3.msra.mxu0 %v2572_v25  ;;  %v2446_v25 = vld [vmem:[%s3117_s1 + $0x8] sm:$0xff] }
0x1310   :  { %v1343_v44 = vsel %vm42_vm2, %v1337_v42, %v1341_v43  ;;  %2313 = vmatprep.subr.mxu0 %v2457_v0 }
0x1311   :  { %2294 = vmatmul.mubr.msk.f32.vlgmr.msra.gmra.mxu1 %vm149_vm3, %v1343_v44  ;;  %2314 = vmatpush3.msra.mxu0 %v2579_v26  ;;  %v2447_v26 = vld [vmem:[%s3117_s1] sm:$0xff] }
0x1312   :  { %2327 = vmatpush3.msra.mxu1 %v2444_v23  ;;  %2334 = vmatprep.mubr.msk.f32.mxu1 %vm2458_vm0, %v2457_v0 }
0x1313   :  { %2328 = vmatprep.subr.mxu1 %v2457_v0  ;;  %2315 = vmatprep.subr.mxu0 %v2457_v0 }
0x1314   :  { %2329 = vmatpush3.msra.mxu1 %v2445_v24  ;;  %2316 = vmatpush3.msra.mxu0 %v2586_v27  ;;  %v1947_v27 = vld [vmem:[%s3118_s0 + $0x38] sm:$0xff] }
0x1315   :  { %2330 = vmatprep.subr.mxu1 %v2457_v0  ;;  %2317 = vmatprep.subr.mxu0 %v2457_v0 }
0x1316   :  { %2331 = vmatpush3.msra.mxu1 %v2446_v25  ;;  %2318 = vmatpush3.msra.mxu0 %v2593_v28 }
0x1317   :  { %2332 = vmatprep.subr.mxu1 %v2457_v0  ;;  %2319 = vmatprep.subr.mxu0 %v2457_v0 }
0x1318   :  { %2333 = vmatpush3.msra.mxu1 %v2447_v26  ;;  %2320 = vmatpush3.msra.mxu0 %v2601_v30 }
0x1319   :  { %2321 = vmatprep.subr.mxu0 %v2457_v0  ;;  %2337 = vmatprep.subr.mxu1 %v2457_v0 }
0x131a   :  { %2322 = vmatpush3.msra.mxu0 %v2610_v31 }
0x131b   :  { %2356 = vmatprep.subr.mxu0 %v2457_v0 }
0x13ca   :  { %v1508_v28 = vpop.f32.mrf.mxu0 }
0x13cb   :  { %v1512_v45 = vadd.f32 %v1947_v27, %v1508_v28 }
0x13cc   :  { %v2306_v46 = vpop.f32.mrf.mxu0 }
0x13cd   :  { %v1513_v47 = vmul.f32 %v1512_v45, %v2545_v9 }
0x13cf   :  { %2424 = vtanh.f32 %v1513_v47 }
0x13d1   :  { %v1413_v48 = vpop.f32.mrf.mxu1 }
0x13d2   :  { %v1414_v30 = vadd.f32 %v2652_v37, %v1413_v48 }
0x13d3   :  { %v2295_v49 = vpop.f32.mrf.mxu1 }
0x13d4   :  { %v1417_v50 = vmul.f32 %v1414_v30, %v2545_v9 }
0x13d6   :  { %2426 = vtanh.f32 %v1417_v50 }
0x13dc   :  { %v2425_v31 = vpop.eup %2424 }
0x13dd   :  { %v1515_v51 = vmul.f32 %v2425_v31, %v2545_v9 }
0x13df   :  { %v1516_v52 = vadd.f32 %v1515_v51, %v2548_v15 }
0x13e1   :  { %1519 = vrot.lane.b32.xlu1 %v1516_v52, %s2460_s7  ;;  %v1517_v59 = vmul.f32 %v1516_v52, %v2950_v29 }
0x13e3   :  { %v2427_v53 = vpop.eup %2426 }
0x13e4   :  { %v1419_v54 = vmul.f32 %v2427_v53, %v2545_v9 }
0x13e6   :  { %v1420_v55 = vadd.f32 %v1419_v54, %v2548_v15 }
0x13e8   :  { %1423 = vrot.lane.b32.xlu0 %v1420_v55, %s2460_s7  ;;  %v1421_v62 = vmul.f32 %v1420_v55, %v2954_v34 }
0x1453   :  { %v1520_v56 = vpop.permute.xlu1 %1519 }
0x1454   :  { %v1522_v37 = vmul.f32 %v1520_v56, %v1516_v52 }
0x1456   :  { %1524 = vrot.lane.b32.xlu1 %v1522_v37, %s2461_s8 }
0x145a   :  { %v1424_v57 = vpop.permute.xlu0 %1423 }
0x145b   :  { %v1426_v58 = vmul.f32 %v1424_v57, %v1420_v55 }
0x145d   :  { %1428 = vrot.lane.b32.xlu0 %v1426_v58, %s2461_s8 }
0x14c8   :  { %v1525_v60 = vpop.permute.xlu1 %1524 }
0x14c9   :  { %v3015_v61 = vadd.f32 %v1525_v60, %v1517_v59 }
0x14cb   :  { %2428 = vtanh.f32 %v3015_v61 }
0x14cf   :  { %v1429_v1 = vpop.permute.xlu0 %1428 }
0x14d0   :  { %v3019_v2 = vadd.f32 %v1429_v1, %v1421_v62 }
0x14d2   :  { %2430 = vtanh.f32 %v3019_v2 }
0x14d8   :  { %v2429_v3 = vpop.eup %2428 }
0x14d9   :  { %1530 = vrot.lane.b32.xlu1 %v2429_v3, %s2460_s7 }
0x14df   :  { %v2431_v63 = vpop.eup %2430 }
0x14e0   :  { %1434 = vrot.lane.b32.xlu0 %v2431_v63, %s2460_s7 }
0x154b   :  { %v1531_v4 = vpop.permute.xlu1 %1530 }
0x154c   :  { %v1533_v5 = vmul.f32 %v1531_v4, %v1516_v52 }
0x154e   :  { %1535 = vrot.lane.b32.xlu0 %v1533_v5, %s2460_s7  ;;  %v1839_v5 = vld [vmem:[%s3121_s4 + $0x18] sm:$0xff] }
0x1552   :  { %v1435_v6 = vpop.permute.xlu0 %1434 }
0x1553   :  { %v1437_v7 = vmul.f32 %v1435_v6, %v1420_v55  ;;  %v1836_v6 = vld [vmem:[%s3121_s4] sm:$0xff] }
0x1555   :  { %1539 = vrot.lane.b32.xlu1 %v1437_v7, %s2461_s8 }
0x15c0   :  { %v1536_v8 = vpop.permute.xlu0 %1535 }
0x15c1   :  { %2335 = vmatmul.mubr.msk.f32.vlgmr.msra.gmra.mxu1 %vm42_vm2, %v1536_v8 }
0x15c2   :  { %2338 = vmatpush3.msra.mxu1 %v2448_v10  ;;  %2353 = vmatprep.mubr.msk.f32.mxu1 %vm2458_vm0, %v2457_v0 }
0x15c3   :  { %2339 = vmatprep.subr.mxu1 %v2457_v0 }
0x15c4   :  { %2340 = vmatpush3.msra.mxu1 %v2449_v11 }
0x15c5   :  { %2341 = vmatprep.subr.mxu1 %v2457_v0 }
0x15c6   :  { %2342 = vmatpush3.msra.mxu1 %v2450_v12  ;;  %v1953_v12 = vld [vmem:[%s3122_s5] ss:$0 sm:$0xff] }
0x15c7   :  { %v1540_v13 = vpop.permute.xlu1 %1539  ;;  %2343 = vmatprep.subr.mxu1 %v2457_v0 }
0x15c8   :  { %v1542_v14 = vsel %vm42_vm2, %v1536_v8, %v1540_v13  ;;  %2344 = vmatpush3.msra.mxu1 %v2451_v16 }
0x15c9   :  { %2324 = vmatmul.mubr.msk.f32.vlgmr.msra.gmra.mxu0 %vm149_vm3, %v1542_v14  ;;  %2345 = vmatprep.subr.mxu1 %v2457_v0 }
0x15ca   :  { %2346 = vmatpush3.msra.mxu1 %v2452_v17  ;;  %2364 = vmatprep.mubr.msk.f32.mxu0 %vm2458_vm0, %v2457_v0 }
0x15cb   :  { %2347 = vmatprep.subr.mxu1 %v2457_v0  ;;  %2357 = vmatpush3.msra.mxu0 %v1839_v5 }
0x15cc   :  { %2348 = vmatpush3.msra.mxu1 %v2453_v18  ;;  %2358 = vmatprep.subr.mxu0 %v2457_v0 }
0x15cd   :  { %2349 = vmatprep.subr.mxu1 %v2457_v0 }
0x15ce   :  { %2350 = vmatpush3.msra.mxu1 %v2454_v19 }
0x15cf   :  { %2351 = vmatprep.subr.mxu1 %v2457_v0 }
0x15d0   :  { %2352 = vmatpush3.msra.mxu1 %v2455_v20 }
0x1681   :  { %v1707_v22 = vpop.f32.mrf.mxu1 }
0x1682   :  { %v1711_v29 = vadd.f32 %v1950_v21, %v1707_v22 }
0x1683   :  { %v2336_v32 = vpop.f32.mrf.mxu1 }
0x1684   :  { %v1712_v33 = vmul.f32 %v1711_v29, %v2545_v9 }
0x1686   :  { %2432 = vtanh.f32 %v1712_v33 }
0x1689   :  { %v1612_v34 = vpop.f32.mrf.mxu0 }
0x168a   :  { %v1613_v36 = vadd.f32 %v2456_v35, %v1612_v34 }
0x168b   :  { %v2325_v38 = vpop.f32.mrf.mxu0 }
0x168c   :  { %v1616_v39 = vmul.f32 %v1613_v36, %v2545_v9 }
0x168e   :  { %2434 = vtanh.f32 %v1616_v39 }
0x1693   :  { %v2433_v40 = vpop.eup %2432 }
0x1694   :  { %v1714_v41 = vmul.f32 %v2433_v40, %v2545_v9 }
0x1696   :  { %v1715_v42 = vadd.f32 %v1714_v41, %v2548_v15 }
0x1698   :  { %1718 = vrot.lane.b32.xlu1 %v1715_v42, %s2460_s7  ;;  %v1716_v28 = vmul.f32 %v1715_v42, %v3015_v61 }
0x169b   :  { %v2435_v43 = vpop.eup %2434 }
0x169c   :  { %v1618_v44 = vmul.f32 %v2435_v43, %v2545_v9 }
0x169e   :  { %v1619_v23 = vadd.f32 %v1618_v44, %v2548_v15 }
0x16a0   :  { %1622 = vrot.lane.b32.xlu0 %v1619_v23, %s2460_s7  ;;  %v1620_v47 = vmul.f32 %v1619_v23, %v3019_v2 }
0x170a   :  { %v1719_v24 = vpop.permute.xlu1 %1718 }
0x170b   :  { %v1721_v25 = vmul.f32 %v1719_v24, %v1715_v42 }
0x170d   :  { %1723 = vrot.lane.b32.xlu1 %v1721_v25, %s2461_s8 }
0x1712   :  { %v1623_v26 = vpop.permute.xlu0 %1622 }
0x1713   :  { %v1625_v27 = vmul.f32 %v1623_v26, %v1619_v23 }
0x1715   :  { %1627 = vrot.lane.b32.xlu0 %v1625_v27, %s2461_s8 }
0x177f   :  { %v1724_v45 = vpop.permute.xlu1 %1723 }
0x1780   :  { %v1726_v46 = vadd.f32 %v1724_v45, %v1716_v28 }
0x1782   :  { %2436 = vtanh.f32 %v1726_v46 }
0x1787   :  { %v1628_v48 = vpop.permute.xlu0 %1627 }
0x1788   :  { %v1630_v30 = vadd.f32 %v1628_v48, %v1620_v47 }
0x178a   :  { %2438 = vtanh.f32 %v1630_v30 }
0x178f   :  { %v2437_v49 = vpop.eup %2436 }
0x1790   :  { %1729 = vrot.lane.b32.xlu1 %v2437_v49, %s2460_s7 }
0x1797   :  { %v2439_v50 = vpop.eup %2438 }
0x1798   :  { %1633 = vrot.lane.b32.xlu0 %v2439_v50, %s2460_s7 }
0x1802   :  { %v1730_v31 = vpop.permute.xlu1 %1729 }
0x1803   :  { %v1732_v51 = vmul.f32 %v1730_v31, %v1715_v42 }
0x1805   :  { %1734 = vrot.lane.b32.xlu0 %v1732_v51, %s2460_s7 }
0x180a   :  { %v1634_v52 = vpop.permute.xlu0 %1633 }
0x180b   :  { %v1636_v53 = vmul.f32 %v1634_v52, %v1619_v23 }
0x180d   :  { %1738 = vrot.lane.b32.xlu1 %v1636_v53, %s2461_s8 }
0x1877   :  { %v1735_v54 = vpop.permute.xlu0 %1734 }
0x187f   :  { %v1739_v55 = vpop.permute.xlu1 %1738 }
0x1880   :  { %v1741_v56 = vsel %vm42_vm2, %v1735_v54, %v1739_v55 }
0x1881   :  { %2354 = vmatmul.mubr.msk.f32.vlgmr.msra.gmra.mxu1 %vm149_vm3, %v1741_v56 }
0x1941   :  { %v1811_v37 = vpop.f32.mrf.mxu1 }
0x1942   :  { %v1812_v57 = vadd.f32 %v2456_v35, %v1811_v37 }
0x1943   :  { %v2355_v58 = vpop.f32.mrf.mxu1 }
0x1944   :  { %v1815_v59 = vmul.f32 %v1812_v57, %v2545_v9 }
0x1946   :  { %2440 = vtanh.f32 %v1815_v59 }
0x1953   :  { %v2441_v60 = vpop.eup %2440 }
0x1954   :  { %v1817_v61 = vmul.f32 %v2441_v60, %v2545_v9  ;;  %v1838_v9 = vld [vmem:[%s3121_s4 + $0x10] sm:$0xff] }
0x1955   :  { %2359 = vmatpush3.msra.mxu0 %v1838_v9 }
0x1956   :  { %v1818_v62 = vadd.f32 %v1817_v61, %v2548_v15  ;;  %v1837_v15 = vld [vmem:[%s3121_s4 + $0x8] sm:$0xff]  ;;  %2360 = vmatprep.subr.mxu0 %v2457_v0 }
0x1957   :  { %2361 = vmatpush3.msra.mxu0 %v1837_v15 }
0x1958   :  { %1821 = vrot.lane.b32.xlu0 %v1818_v62, %s2460_s7  ;;  %v1819_v3 = vmul.f32 %v1818_v62, %v1630_v30  ;;  %2362 = vmatprep.subr.mxu0 %v2457_v0 }
0x1959   :  { %2363 = vmatpush3.msra.mxu0 %v1836_v6 }
0x19ca   :  { %v1822_v1 = vpop.permute.xlu0 %1821 }
0x19cb   :  { %v1824_v2 = vmul.f32 %v1822_v1, %v1818_v62 }
0x19cd   :  { %1826 = vrot.lane.b32.xlu1 %v1824_v2, %s2461_s8 }
0x1a3f   :  { %v1827_v63 = vpop.permute.xlu1 %1826 }
0x1a40   :  { %v1829_v4 = vadd.f32 %v1827_v63, %v1819_v3 }
0x1a42   :  { %2442 = vtanh.f32 %v1829_v4 }
0x1a4f   :  { %v2443_v7 = vpop.eup %2442 }
0x1a50   :  { %1832 = vrot.lane.b32.xlu0 %v2443_v7, %s2460_s7 }
0x1ac2   :  { %v1833_v8 = vpop.permute.xlu0 %1832 }
0x1ac3   :  { %v1835_v10 = vmul.f32 %v1833_v8, %v1818_v62 }
0x1ac5   :  { %1848 = vrot.lane.b32.xlu1 %v1835_v10, %s2460_s7 }
0x1b37   :  { %v1849_v11 = vpop.permute.xlu1 %1848 }
0x1b38   :  { %2365 = vmatmul.mubr.msk.f32.vlgmr.msra.gmra.mxu0 %vm42_vm2, %v1849_v11 }
0x1bf8   :  { %v1918_v13 = vpop.f32.mrf.mxu0 }
0x1bf9   :  { %v1919_v14 = vadd.f32 %v1953_v12, %v1918_v13 }
0x1bfa   :  { %v2366_v16 = vpop.f32.mrf.mxu0 }
0x1bfb   :  { %1922 = vst [vmem:[%s3123_s6] sm:$0xff] %v1919_v14 }

</bundles_post_ra>
